<compile_context>
chip_gen: v5e
topology: v5e:2x2
jax: 0.10.0
libtpu: 0.0.40
codegen_flags: <defaults>
</compile_context>

<pallas_src>
import functools

import jax
import jax.numpy as jnp
from jax.experimental import pallas as pl
from jax.experimental.pallas import tpu as pltpu


def _round_up(x: int, m: int) -> int:
    return ((x + m - 1) // m) * m


_VMEM_CAP = None


def _tpu_vmem_capacity_bytes() -> int:
    """Physical VMEM per TensorCore; conservative 64 MiB fallback (v7x-class)."""
    global _VMEM_CAP
    if _VMEM_CAP is None:
        try:
            _VMEM_CAP = int(pltpu.get_tpu_info().vmem_capacity_bytes)
        except Exception:
            _VMEM_CAP = 64 * 1024 * 1024
    return _VMEM_CAP


@jax.tree_util.register_pytree_node_class
class SwiGLUWeights:
    """Pre-packed SwiGLU weights.  Integer metadata is pytree aux data, so it
    stays a concrete Python int even when this object is passed through jit."""

    def __init__(self, w13_packed, w2_t, dim, dim_p, hidden_p, th):
        self.w13_packed = w13_packed  # (dim_p, nh*2*th) bf16, per-tile [W1^T | W3^T]
        self.w2_t = w2_t              # (hidden_p, dim_p) bf16  (= W2^T, zero-padded)
        self.dim = dim                # logical model dim
        self.dim_p = dim_p            # dim padded to multiple of 128
        self.hidden_p = hidden_p      # hidden padded to multiple of th
        self.th = th                  # hidden tile size (multiple of 128)

    def tree_flatten(self):
        return (self.w13_packed, self.w2_t), (self.dim, self.dim_p, self.hidden_p, self.th)

    @classmethod
    def tree_unflatten(cls, aux, children):
        return cls(children[0], children[1], *aux)


def prepare_swiglu_weights(w13, w2, *, th=None, compute_dtype=jnp.bfloat16):
    """Pack / transpose / cast the torch-layout weights once (off the hot path).

    w13: (2*hidden, dim)  -- rows [0:hidden] are W1, rows [hidden:] are W3.
    w2 : (dim, hidden)
    """
    two_hidden, dim = w13.shape
    hidden = two_hidden // 2
    assert w13.shape == (2 * hidden, dim)
    assert w2.shape == (dim, hidden)

    dim_p = _round_up(dim, 128)
    if th is None:
        # th=512 fits comfortably on 128 MiB VMEM (v5e/v6e); 256 on v7x (64 MiB).
        th_cap = 512 if _tpu_vmem_capacity_bytes() > 96 * 1024 * 1024 else 256
        th = min(_round_up(hidden, 128), th_cap)
    assert th % 128 == 0
    hidden_p = _round_up(hidden, th)
    nh = hidden_p // th

    w1_t = w13[:hidden, :].T.astype(compute_dtype)  # (dim, hidden)
    w3_t = w13[hidden:, :].T.astype(compute_dtype)  # (dim, hidden)

    w1_tp = jnp.zeros((dim_p, hidden_p), compute_dtype).at[:dim, :hidden].set(w1_t)
    w3_tp = jnp.zeros((dim_p, hidden_p), compute_dtype).at[:dim, :hidden].set(w3_t)

    # Interleave per hidden tile so one (dim_p, 2*th) weight block feeds one
    # fused gate+value matmul whose output splits on a lane-aligned boundary.
    w13_packed = jnp.stack(
        [w1_tp.reshape(dim_p, nh, th), w3_tp.reshape(dim_p, nh, th)], axis=2
    ).reshape(dim_p, nh * 2 * th)

    w2_tp = (
        jnp.zeros((hidden_p, dim_p), compute_dtype)
        .at[:hidden, :dim]
        .set(w2.T.astype(compute_dtype))
    )

    return SwiGLUWeights(w13_packed, w2_tp, dim=dim, dim_p=dim_p,
                         hidden_p=hidden_p, th=th)


def _swiglu_kernel(x_ref, w13_ref, w2_ref, o_ref, acc_ref):
    # x_ref  : (tm, dim_p)     bf16 token tile          (resident across k)
    # w13_ref: (dim_p, 2*th)   bf16 packed [W1^T|W3^T] hidden tile
    # w2_ref : (th, dim_p)     bf16 W2^T hidden tile
    # o_ref  : (tm, dim_p)     output tile              (resident across k)
    # acc_ref: (tm, dim_p)     f32 VMEM accumulator
    k = pl.program_id(1)
    nk = pl.num_programs(1)
    th = w2_ref.shape[0]

    @pl.when(k == 0)
    def _init():
        acc_ref[...] = jnp.zeros_like(acc_ref)

    # One fused MXU launch for gate + value projection (bf16 in, f32 acc).
    h = jnp.dot(x_ref[...], w13_ref[...], preferred_element_type=jnp.float32)
    x1 = h[:, :th]          # lane-aligned static slices (th % 128 == 0)
    x3 = h[:, th:]
    gated = (x1 * jax.nn.sigmoid(x1)) * x3          # SiLU * value, f32 (VPU/EUP)

    partial = jnp.dot(
        gated.astype(w2_ref.dtype), w2_ref[...], preferred_element_type=jnp.float32
    )
    acc = acc_ref[...] + partial

    # Last step writes the output directly from the fresh value (no acc
    # store + reload in a separate finalize pass).
    @pl.when(k < nk - 1)
    def _carry():
        acc_ref[...] = acc

    @pl.when(k == nk - 1)
    def _finalize():
        o_ref[...] = acc.astype(o_ref.dtype)


@functools.partial(jax.jit, static_argnames=("tm", "out_dtype"))
def packed_swiglu_ffn(x, weights: SwiGLUWeights, *, tm=None, out_dtype=None):
    """x: (..., dim). Returns (..., dim) in `out_dtype` (default: x.dtype)."""
    dim, dim_p, hidden_p, th = weights.dim, weights.dim_p, weights.hidden_p, weights.th
    assert x.shape[-1] == dim
    compute_dtype = weights.w13_packed.dtype
    out_dtype = jnp.dtype(out_dtype) if out_dtype is not None else jnp.dtype(x.dtype)

    vmem_cap = _tpu_vmem_capacity_bytes()
    if tm is None:
        # Bigger tm = more weight reuse (arithmetic intensity ~ tm FLOPs/weight
        # byte); 512 where VMEM is plentiful (v5e/v6e), 256 on v7x (64 MiB).
        tm = 512 if vmem_cap > 96 * 1024 * 1024 else 256
    assert tm % 16 == 0  # bf16 sublane packing

    lead_shape = x.shape[:-1]
    x2d = x.reshape(-1, dim)
    M = x2d.shape[0]
    # Adaptive tm for small/decode-sized batches: don't pad 1..few tokens to 256+.
    tm_eff = max(16, min(tm, _round_up(M, 16)))
    M_p = _round_up(M, tm_eff)
    nh = hidden_p // th
    # NOTE(v7x megacore): for full chip utilization prefer M_p // tm_eff >= 2 so
    # the "parallel" token axis shards across both TensorCores.

    # Cast once to bf16; pad only if actually needed (skips an extra HBM
    # read+write of the activations in the common aligned case).
    x_c = x2d.astype(compute_dtype)
    need_pad = (M_p != M) or (dim_p != dim)
    x_p = jnp.pad(x_c, ((0, M_p - M), (0, dim_p - dim))) if need_pad else x_c

    # VMEM budget: double-buffered x / W13 / W2 / out tiles + f32 accumulator
    # + in-kernel f32 intermediates (h, gated, bf16 cast of gated).
    cdb = jnp.dtype(compute_dtype).itemsize
    odb = out_dtype.itemsize
    vmem_est = (
        2 * tm_eff * dim_p * cdb            # x tile
        + 2 * dim_p * 2 * th * cdb          # packed W13 tile
        + 2 * th * dim_p * cdb              # W2^T tile
        + 2 * tm_eff * dim_p * odb          # out tile
        + tm_eff * dim_p * 4                # f32 accumulator scratch
        + tm_eff * 2 * th * 4               # h intermediate (f32)
        + tm_eff * th * 4                   # gated (f32)
        + tm_eff * th * cdb                 # gated bf16 cast
    )
    # Cap at ~90% of physical VMEM (v7x: 64 MiB) so compilation never over-asks.
    vmem_limit = min(int(vmem_cap * 0.9),
                     max(32 * 1024 * 1024, int(vmem_est * 1.25)))

    out = pl.pallas_call(
        _swiglu_kernel,
        out_shape=jax.ShapeDtypeStruct((M_p, dim_p), out_dtype),
        grid_spec=pltpu.PrefetchScalarGridSpec(
            num_scalar_prefetch=0,
            grid=(M_p // tm_eff, nh),                                # (tokens, hidden-reduction)
            in_specs=[
                pl.BlockSpec((tm_eff, dim_p), lambda i, k: (i, 0)),  # x tile (resident over k)
                pl.BlockSpec((dim_p, 2 * th), lambda i, k: (0, k)),  # packed W13 hidden tile
                pl.BlockSpec((th, dim_p), lambda i, k: (k, 0)),      # W2^T hidden tile
            ],
            out_specs=pl.BlockSpec((tm_eff, dim_p), lambda i, k: (i, 0)),
            scratch_shapes=[pltpu.VMEM((tm_eff, dim_p), jnp.float32)],
        ),
        compiler_params=pltpu.CompilerParams(
            dimension_semantics=("parallel", "arbitrary"),
            vmem_limit_bytes=vmem_limit,
        ),
    )(x_p, weights.w13_packed, weights.w2_t)

    if need_pad:
        out = out[:M, :dim]
    return out.reshape(*lead_shape, dim)


def reference_swiglu_ffn(x, w13, w2, compute_dtype=jnp.bfloat16):
    """Reference matching the kernel's numerics (bf16 matmul inputs, f32 accumulation)."""
    hidden = w2.shape[-1]
    xc = x.astype(compute_dtype).astype(jnp.float32)
    w13c = w13.astype(compute_dtype).astype(jnp.float32)
    w2c = w2.astype(compute_dtype).astype(jnp.float32)
    h = xc @ w13c.T
    x1, x3 = h[..., :hidden], h[..., hidden:]
    gated = (jax.nn.silu(x1) * x3).astype(compute_dtype).astype(jnp.float32)
    return (gated @ w2c.T).astype(x.dtype)


if __name__ == "__main__":
    # ModelConfig: hidden_dim=96, ffn_factor=4 -> hidden=384.
    # Shapes chosen so padding (tokens, dim, hidden) and the reduction grid
    # axis (nh=2 with th=256) are all exercised.
    batch, seq, dim, ffn_factor = 2, 96, 96, 4
    hidden = int(dim * ffn_factor)

    key = jax.random.PRNGKey(0)
    kx, k13, k2 = jax.random.split(key, 3)
    x = jax.random.normal(kx, (batch, seq, dim), dtype=jnp.float32)
    # nn.Linear weight layouts: w13 (2*hidden, dim), w2 (dim, hidden); bias=False.
    w13 = jax.random.normal(k13, (2 * hidden, dim), dtype=jnp.float32) * 0.05
    w2 = jax.random.normal(k2, (dim, hidden), dtype=jnp.float32) * 0.05

    # Weight packing happens once, outside the hot path.
    weights = prepare_swiglu_weights(w13, w2, th=256)

    out = packed_swiglu_ffn(x, weights)   # generation-aware tm + adaptive clamp to M
    out = jax.block_until_ready(out)

    ref = reference_swiglu_ffn(x, w13, w2)
    assert out.shape == x.shape
    assert jnp.allclose(out, ref, atol=1e-2, rtol=1e-2), "mismatch vs reference"

    print("KERNEL_OK")
</pallas_src>

<mosaic_0001>
module attributes {stable_mosaic.version = 11 : i64} {
  func.func @_swiglu_kernel(%arg0: i32, %arg1: i32, %arg2: memref<192x128xbf16, #tpu.memory_space<vmem>>, %arg3: memref<128x512xbf16, #tpu.memory_space<vmem>>, %arg4: memref<256x128xbf16, #tpu.memory_space<vmem>>, %arg5: memref<192x128xf32, #tpu.memory_space<vmem>>, %arg6: memref<192x128xf32, #tpu.memory_space<vmem>>) attributes {dimension_semantics = [#tpu.dimension_semantics<parallel>, #tpu.dimension_semantics<arbitrary>], iteration_bounds = array<i64: 1, 2>, scalar_prefetch = 0 : i64, scratch_operands = 1 : i64, tpu.core_type = #tpu.core_type<tc>, window_params = [{transform_indices = @transform_0, window_bounds = array<i64: 192, 128>}, {transform_indices = @transform_1, window_bounds = array<i64: 128, 512>}, {transform_indices = @transform_2, window_bounds = array<i64: 256, 128>}, {transform_indices = @transform_3, window_bounds = array<i64: 192, 128>}]} {
    %c0_i32 = arith.constant 0 : i32
    %0 = arith.cmpi eq, %arg1, %c0_i32 : i32
    %1 = arith.extui %0 : i1 to i32
    %c0_i32_0 = arith.constant 0 : i32
    %2 = arith.cmpi ne, %1, %c0_i32_0 : i32
    scf.if %2 {
      %cst_13 = arith.constant 0.000000e+00 : f32
      %26 = vector.broadcast %cst_13 : f32 to vector<192x128xf32>
      %c0_14 = arith.constant 0 : index
      %c0_15 = arith.constant 0 : index
      %27 = vector.load %arg6[%c0_14, %c0_15] : memref<192x128xf32, #tpu.memory_space<vmem>>, vector<192x128xf32>
      tpu.vector_store %arg6[%c0_14, %c0_15], %26 {strides = array<i32>} : memref<192x128xf32, #tpu.memory_space<vmem>>, vector<192x128xf32>,
    } else {
    }
    %c0 = arith.constant 0 : index
    %c0_1 = arith.constant 0 : index
    %3 = vector.load %arg2[%c0, %c0_1] : memref<192x128xbf16, #tpu.memory_space<vmem>>, vector<192x128xbf16>
    %c0_2 = arith.constant 0 : index
    %c0_3 = arith.constant 0 : index
    %4 = vector.load %arg3[%c0_2, %c0_3] : memref<128x512xbf16, #tpu.memory_space<vmem>>, vector<128x512xbf16>
    %cst = arith.constant dense<0.000000e+00> : vector<192x512xf32>
    %5 = tpu.matmul %3, %4, %cst {dimension_numbers = #tpu.dot_dimension_numbers<[1], [0], [0], [1], [0, 0, 1, 1], [], []>} : vector<192x128xbf16>, vector<128x512xbf16>, vector<192x512xf32> -> vector<192x512xf32>
    %6 = vector.extract_strided_slice %5 {offsets = [0, 0], sizes = [192, 256], strides = [1, 1]} : vector<192x512xf32> to vector<192x256xf32>
    %7 = vector.extract_strided_slice %5 {offsets = [0, 256], sizes = [192, 256], strides = [1, 1]} : vector<192x512xf32> to vector<192x256xf32>
    %8 = arith.negf %6 : vector<192x256xf32>
    %9 = math.exp %8 : vector<192x256xf32>
    %cst_4 = arith.constant 1.000000e+00 : f32
    %10 = vector.broadcast %cst_4 : f32 to vector<192x256xf32>
    %11 = arith.addf %10, %9 : vector<192x256xf32>
    %12 = arith.divf %10, %11 : vector<192x256xf32>
    %13 = arith.mulf %6, %12 : vector<192x256xf32>
    %14 = arith.mulf %13, %7 : vector<192x256xf32>
    %15 = arith.truncf %14 : vector<192x256xf32> to vector<192x256xbf16>
    %c0_5 = arith.constant 0 : index
    %c0_6 = arith.constant 0 : index
    %16 = vector.load %arg4[%c0_5, %c0_6] : memref<256x128xbf16, #tpu.memory_space<vmem>>, vector<256x128xbf16>
    %cst_7 = arith.constant dense<0.000000e+00> : vector<192x128xf32>
    %17 = tpu.matmul %15, %16, %cst_7 {dimension_numbers = #tpu.dot_dimension_numbers<[1], [0], [0], [1], [0, 0, 1, 1], [], []>} : vector<192x256xbf16>, vector<256x128xbf16>, vector<192x128xf32> -> vector<192x128xf32>
    %c0_8 = arith.constant 0 : index
    %c0_9 = arith.constant 0 : index
    %18 = vector.load %arg6[%c0_8, %c0_9] : memref<192x128xf32, #tpu.memory_space<vmem>>, vector<192x128xf32>
    %19 = arith.addf %18, %17 : vector<192x128xf32>
    %c1_i32 = arith.constant 1 : i32
    %20 = arith.cmpi slt, %arg1, %c1_i32 : i32
    %21 = arith.extui %20 : i1 to i32
    %c0_i32_10 = arith.constant 0 : i32
    %22 = arith.cmpi ne, %21, %c0_i32_10 : i32
    scf.if %22 {
      %c0_13 = arith.constant 0 : index
      %c0_14 = arith.constant 0 : index
      %26 = vector.load %arg6[%c0_13, %c0_14] : memref<192x128xf32, #tpu.memory_space<vmem>>, vector<192x128xf32>
      tpu.vector_store %arg6[%c0_13, %c0_14], %19 {strides = array<i32>} : memref<192x128xf32, #tpu.memory_space<vmem>>, vector<192x128xf32>,
    } else {
    }
    %c1_i32_11 = arith.constant 1 : i32
    %23 = arith.cmpi eq, %arg1, %c1_i32_11 : i32
    %24 = arith.extui %23 : i1 to i32
    %c0_i32_12 = arith.constant 0 : i32
    %25 = arith.cmpi ne, %24, %c0_i32_12 : i32
    scf.if %25 {
      %c0_13 = arith.constant 0 : index
      %c0_14 = arith.constant 0 : index
      %26 = vector.load %arg5[%c0_13, %c0_14] : memref<192x128xf32, #tpu.memory_space<vmem>>, vector<192x128xf32>
      tpu.vector_store %arg5[%c0_13, %c0_14], %19 {strides = array<i32>} : memref<192x128xf32, #tpu.memory_space<vmem>>, vector<192x128xf32>,
    } else {
    }
    return
  }
  func.func @transform_0(%arg0: i32, %arg1: i32) -> (i32, i32) {
    %c0_i32 = arith.constant 0 : i32
    %c0_i32_0 = arith.constant 0 : i32
    return %arg0, %c0_i32 : i32, i32
  }
  func.func @transform_1(%arg0: i32, %arg1: i32) -> (i32, i32) {
    %c0_i32 = arith.constant 0 : i32
    %c0_i32_0 = arith.constant 0 : i32
    return %c0_i32, %arg1 : i32, i32
  }
  func.func @transform_2(%arg0: i32, %arg1: i32) -> (i32, i32) {
    %c0_i32 = arith.constant 0 : i32
    %c0_i32_0 = arith.constant 0 : i32
    return %arg1, %c0_i32 : i32, i32
  }
  func.func @transform_3(%arg0: i32, %arg1: i32) -> (i32, i32) {
    %c0_i32 = arith.constant 0 : i32
    %c0_i32_0 = arith.constant 0 : i32
    return %arg0, %c0_i32 : i32, i32
  }
}

</mosaic_0001>

<bundles_post_ra>
// kernel: packed_swiglu_ffn.1
= control target key start
LH: loop header
LB: loop body
LE: loop exit
PB: predicated region body
PF: predicated region fallthrough
CT: control target
= control target key end

     0   :  { %8 = vsyncpa [#allocation4], 0  ;;  %s5016_s0 = inlined_call_operand.vmem [shape: bf16[192,128], index: 0, kind: input, shape index: {}]   ;;  %s5017_s1 = inlined_call_operand.hbm [shape: bf16[128,1024], index: 1, kind: input, shape index: {}]   ;;  %s5018_s2 = inlined_call_operand.vmem [shape: bf16[512,128], index: 2, kind: input, shape index: {}]   ;;  %s5019_s3 = inlined_call_operand.hbm [shape: f32[192,128], index: 3, kind: output, shape index: {}]  }
   0x1   :  { %10 = vsyncpa [#allocation4 + $0x1], 0 }
   0x2   :  { %11 = vsyncpa [#allocation5], 0  ;;  %s3122_s12 = smov 0   ;;  %s3124_s13 = smov 0  }
   0x3   :  { %s3126_s14 = smov 0   ;;  %s3128_s15 = smov 0  }
   0x4   :  { %s3130_s16 = smov 0   ;;  %s3132_s17 = smov 0  }
   0x5 LB: > { %s2338_s18 = sadd.s32 4294967295, %s3093_s17   ;;  %s26_s19 = sadd.s32 1, %s3089_s16  ;;  %s3093_s17 = sphi %s3132_s17, %s17_s17   ;;  %s3089_s16 = sphi %s3130_s16, %s5236_s16   ;;  %s3085_s15 = sphi %s3128_s15, %s5235_s15   ;;  %s3081_s14 = sphi %s3126_s14, %s5234_s14   ;;  %s3077_s13 = sphi %s3124_s13, %s5233_s13   ;;  %s3073_s12 = sphi %s3122_s12, %s5232_s12  }
   0x6   : > { %p27_p0 = scmp.ge.s32.totalorder %s26_s19, 2  ;;  %s62_s20 = sadd.s32 1, %s3081_s14 }
   0x7   : > { %p69_p1 = scmp.ne.s32.totalorder %s3081_s14, %s3077_s13  ;;  %p70_p2 = scmp.eq.s32.totalorder %s3093_s17, 0 }
   0x8   : > { %s5238_s19 = smov (%p27_p0, %s26_s19), 0  ;;  %p75_p4 = scmp.ne.s32.totalorder %s3077_s13, %s3073_s12 }
   0x9   : > { %p3158_p3 = por %p70_p2, %p69_p1  ;;  %s59_s22 = ssub.s32 %s3089_s16, %s5238_s19 }
   0xa   : > { %p76_p5 = scmp.eq.s32.totalorder %s2338_s18, 0  ;;  %p60_p6 = scmp.eq.s32.totalorder %s59_s22, 0 }
   0xb   : > { %p2731_p8 = scmp.lt.s32.totalorder %s3093_s17, 2  ;;  %s160_s25 = sand.u32 1, %s3081_s14  }
   0xc   : > { %p3167_p7 = por %p76_p5, %p75_p4  ;;  %s2644_s26 = sshll.u32 %s3089_s16, 4 }
   0xd   : > { %s3173_s24 = scalar_select %p60_p6, %s3081_s14, %s62_s20  }
   0xe   : > { %s2342_s27 = sshll.u32 %s160_s25, 8  ;;  %s169_s30 = scalar_lea.hbm %s5017_s1, %s2644_s26 }
   0xf   : > { %s170_s4 = sshll.u32 %s169_s30, 4  ;;  %s164_s5 = scalar_lea.vmem [#allocation3], %s2342_s27  ;;  %s171_s4 = int_to_ptr.hbm [resolvable:$true] %s170_s4 }
  0x10   : > { %s172_s6 = sshll.u32 %s164_s5, 4  ;;  %p2728_p9 = pnand %p2731_p8, %p3158_p3  ;;  %s173_s6 = int_to_ptr.vmem [resolvable:$true] %s172_s6 }
  0x11   : > { %p2345_p10 = scmp.ge.s32.totalorder %s3093_s17, 1  ;;  %s161_s7 = scalar_lea.sflag [#allocation4], %s160_s25 }
  0x12   : > { %s3095_s8 = smov 512   ;;  %s3096_s9 = smov 256  }
  0x13   : > { %s3097_s10 = smov 16   ;;  %p189_p11 = scmp.lt.s32.totalorder %s3093_s17, 3 }
  0x14   : > { %2730 = dma.hbm_to_vmem [thread:$0]  (!%p2728_p9), %s171_s4, 4096, %s173_s6, %s161_s7, %s3095_s8, %s3096_s9, %s3097_s10  }
  0x15   : > { %p190_p12 = pnand %p2345_p10, %p189_p11 }
  0x17   : > { %193 = sbr.rel (%p190_p12) target bundleno = 741 (0x2e5), region = 32 }
  0x1c   : > { %s195_s11 = sand.u32 1, %s3077_s13  }
  0x1d   : > { %s2346_s12 = sshll.u32 %s195_s11, 8  ;;  %s196_s20 = scalar_lea.sflag [#allocation4], %s195_s11 }
  0x1e   : > { %s3185_s22 = scalar_lea.vmem [#allocation3], %s2346_s12 }
  0x1f   : > { %3064 = dma.done.wait (%p3167_p7), %s196_s20, 4096  }
  0x20   : > { %3066 = vsyncadd (%p3167_p7), %s196_s20, 4294963200  ;;  %s2347_s21 = sshll.u32 %s3085_s15, 5  ;;  %p2349_p0 = scmp.ne.s32.totalorder %s3085_s15, 0 }
  0x21   : > { %p236_p13 = scmp.lt.s32.totalorder %s2347_s21, 63 }
  0x22   : > { %245 = sbr.rel (%p2349_p0) target bundleno = 64 (0x40), region = 40 }
  0x23   : > { %s5240_s21 = smov (!%p236_p13, %s2347_s21), 63 }
  0x24   : > { %s2348_s25 = sshll.u32 %s5240_s21, 2 }
  0x25   : > { %s3195_s28 = scalar_lea.vmem %s5018_s2, %s2348_s25 }
  0x27   : > { %v3098_v0 = vmov 0.0  }
  0x28   : > { %246 = vst [vmem:[#allocation2 + $0xb0] sm:$0xff] %v3098_v0 }
  0x29   : > { %247 = vst [vmem:[#allocation2] sm:$0xff] %v3098_v0 }
  0x2a   : > { %248 = vst [vmem:[#allocation2 + $0x10] sm:$0xff] %v3098_v0 }
  0x2b   : > { %249 = vst [vmem:[#allocation2 + $0x48] sm:$0xff] %v3098_v0 }
  0x2c   : > { %250 = vst [vmem:[#allocation2 + $0x60] sm:$0xff] %v3098_v0 }
  0x2d   : > { %251 = vst [vmem:[#allocation2 + $0x28] sm:$0xff] %v3098_v0 }
  0x2e   : > { %252 = vst [vmem:[#allocation2 + $0x40] sm:$0xff] %v3098_v0 }
  0x2f   : > { %253 = vst [vmem:[#allocation2 + $0x78] sm:$0xff] %v3098_v0 }
  0x30   : > { %254 = vst [vmem:[#allocation2 + $0x88] sm:$0xff] %v3098_v0 }
  0x31   : > { %255 = vst [vmem:[#allocation2 + $0x90] sm:$0xff] %v3098_v0 }
  0x32   : > { %256 = vst [vmem:[#allocation2 + $0x18] sm:$0xff] %v3098_v0 }
  0x33   : > { %257 = vst [vmem:[#allocation2 + $0x98] sm:$0xff] %v3098_v0 }
  0x34   : > { %258 = vst [vmem:[#allocation2 + $0x38] sm:$0xff] %v3098_v0 }
  0x35   : > { %259 = vst [vmem:[#allocation2 + $0x50] sm:$0xff] %v3098_v0 }
  0x36   : > { %260 = vst [vmem:[#allocation2 + $0x70] sm:$0xff] %v3098_v0 }
  0x37   : > { %261 = vst [vmem:[#allocation2 + $0xa0] sm:$0xff] %v3098_v0 }
  0x38   : > { %262 = vst [vmem:[#allocation2 + $0xa8] sm:$0xff] %v3098_v0 }
  0x39   : > { %263 = vst [vmem:[#allocation2 + $0x68] sm:$0xff] %v3098_v0 }
  0x3a   : > { %264 = vst [vmem:[#allocation2 + $0x30] sm:$0xff] %v3098_v0 }
  0x3b   : > { %265 = vst [vmem:[#allocation2 + $0x58] sm:$0xff] %v3098_v0 }
  0x3c   : > { %266 = vst [vmem:[#allocation2 + $0x80] sm:$0xff] %v3098_v0 }
  0x3d   : > { %267 = vst [vmem:[#allocation2 + $0xb8] sm:$0xff] %v3098_v0 }
  0x3e   : > { %268 = vst [vmem:[#allocation2 + $0x20] sm:$0xff] %v3098_v0 }
  0x3f   : > { %269 = vst [vmem:[#allocation2 + $0x8] sm:$0xff] %v3098_v0 }
  0x40 PF: > { %v2512_v1 = vld [vmem:[%s3185_s22 + $0xe0] sm:$0xf]  ;;  %v2687_v2 = vld [vmem:[%s3185_s22 + $0xec] sm:$0xf0]  ;;  %v2685_v3 = vld [vmem:[%s3185_s22 + $0xe4] sm:$0xf] }
  0x41   : > { %v2513_v4 = vor.u32 %v2687_v2, %v2512_v1  ;;  %v2514_v5 = vld [vmem:[%s3185_s22 + $0xf0] sm:$0xf0]  ;;  %v2496_v6 = vld [vmem:[%s3185_s22 + $0xc0] sm:$0xf]  ;;  %v2683_v7 = vld [vmem:[%s3185_s22 + $0xcc] sm:$0xf0] }
  0x42   : > { %v2517_v8 = vor.u32 %v2685_v3, %v2514_v5  ;;  %v2681_v9 = vld [vmem:[%s3185_s22 + $0xc4] sm:$0xf]  ;;  %v2498_v10 = vld [vmem:[%s3185_s22 + $0xd0] sm:$0xf0]  ;;  %v2497_v11 = vor.u32 %v2683_v7, %v2496_v6  ;;  %v2480_v13 = vld [vmem:[%s3185_s22 + $0xa0] sm:$0xf] }
  0x43   : > { %2705 = vmatpush.bf16.msra.mxu2 %v2513_v4  ;;  %558 = vmatpush.bf16.msra.mxu0 %v2513_v4  ;;  %v2501_v12 = vor.u32 %v2681_v9, %v2498_v10  ;;  %v2679_v14 = vld [vmem:[%s3185_s22 + $0xac] sm:$0xf0]  ;;  %v2677_v15 = vld [vmem:[%s3185_s22 + $0xa4] sm:$0xf]  ;;  %v2482_v16 = vld [vmem:[%s3185_s22 + $0xb0] sm:$0xf0] }
  0x44   : > { %2713 = vmatpush.bf16.msra.mxu3 %v2517_v8  ;;  %627 = vmatpush.bf16.msra.mxu1 %v2517_v8  ;;  %v2481_v17 = vor.u32 %v2679_v14, %v2480_v13  ;;  %v2485_v18 = vor.u32 %v2677_v15, %v2482_v16  ;;  %v2464_v19 = vld [vmem:[%s3185_s22 + $0x80] sm:$0xf]  ;;  %v2675_v20 = vld [vmem:[%s3185_s22 + $0x8c] sm:$0xf0]  ;;  %v2673_v21 = vld [vmem:[%s3185_s22 + $0x84] sm:$0xf] }
  0x45   : > { %v2466_v22 = vld [vmem:[%s3185_s22 + $0x90] sm:$0xf0]  ;;  %v2465_v23 = vor.u32 %v2675_v20, %v2464_v19  ;;  %v2448_v25 = vld [vmem:[%s3185_s22 + $0x60] sm:$0xf]  ;;  %v2671_v26 = vld [vmem:[%s3185_s22 + $0x6c] sm:$0xf0] }
  0x46   : > { %v2469_v24 = vor.u32 %v2673_v21, %v2466_v22  ;;  %v2669_v27 = vld [vmem:[%s3185_s22 + $0x64] sm:$0xf]  ;;  %v2450_v28 = vld [vmem:[%s3185_s22 + $0x70] sm:$0xf0]  ;;  %v2449_v29 = vor.u32 %v2671_v26, %v2448_v25  ;;  %v2432_v31 = vld [vmem:[%s3185_s22 + $0x40] sm:$0xf] }
  0x47   : > { %2706 = vmatpush.bf16.msra.mxu2 %v2497_v11  ;;  %559 = vmatpush.bf16.msra.mxu0 %v2497_v11  ;;  %v2453_v30 = vor.u32 %v2669_v27, %v2450_v28  ;;  %v2667_v32 = vld [vmem:[%s3185_s22 + $0x4c] sm:$0xf0]  ;;  %v2665_v33 = vld [vmem:[%s3185_s22 + $0x44] sm:$0xf]  ;;  %v2434_v34 = vld [vmem:[%s3185_s22 + $0x50] sm:$0xf0] }
  0x48   : > { %2714 = vmatpush.bf16.msra.mxu3 %v2501_v12  ;;  %628 = vmatpush.bf16.msra.mxu1 %v2501_v12  ;;  %v2433_v35 = vor.u32 %v2667_v32, %v2432_v31  ;;  %v2437_v36 = vor.u32 %v2665_v33, %v2434_v34  ;;  %v2416_v37 = vld [vmem:[%s3185_s22 + $0x20] sm:$0xf]  ;;  %v2663_v38 = vld [vmem:[%s3185_s22 + $0x2c] sm:$0xf0]  ;;  %v2661_v39 = vld [vmem:[%s3185_s22 + $0x24] sm:$0xf] }
  0x49   : > { %v2418_v40 = vld [vmem:[%s3185_s22 + $0x30] sm:$0xf0]  ;;  %v2417_v41 = vor.u32 %v2663_v38, %v2416_v37  ;;  %v2400_v43 = vld [vmem:[%s3185_s22] sm:$0xf]  ;;  %v2659_v44 = vld [vmem:[%s3185_s22 + $0xc] sm:$0xf0] }
  0x4a   : > { %v2421_v42 = vor.u32 %v2661_v39, %v2418_v40  ;;  %v2657_v45 = vld [vmem:[%s3185_s22 + $0x4] sm:$0xf]  ;;  %v2402_v46 = vld [vmem:[%s3185_s22 + $0x10] sm:$0xf0]  ;;  %v2520_v47 = vld [vmem:[%s3185_s22 + $0xe8] sm:$0xf]  ;;  %v2401_v51 = vor.u32 %v2659_v44, %v2400_v43 }
  0x4b   : > { %2707 = vmatpush.bf16.msra.mxu2 %v2481_v17  ;;  %560 = vmatpush.bf16.msra.mxu0 %v2481_v17  ;;  %v2688_v48 = vld [vmem:[%s3185_s22 + $0xf4] sm:$0xf0]  ;;  %v2686_v49 = vld [vmem:[%s3185_s22 + $0xec] sm:$0xf]  ;;  %v2522_v50 = vld [vmem:[%s3185_s22 + $0xf8] sm:$0xf0]  ;;  %v2405_v52 = vor.u32 %v2657_v45, %v2402_v46 }
  0x4c   : > { %2715 = vmatpush.bf16.msra.mxu3 %v2485_v18  ;;  %629 = vmatpush.bf16.msra.mxu1 %v2485_v18  ;;  %v2521_v53 = vor.u32 %v2688_v48, %v2520_v47  ;;  %v2525_v54 = vor.u32 %v2686_v49, %v2522_v50  ;;  %v2504_v55 = vld [vmem:[%s3185_s22 + $0xc8] sm:$0xf]  ;;  %v2684_v56 = vld [vmem:[%s3185_s22 + $0xd4] sm:$0xf0]  ;;  %v3239_v57 = vld [vmem:[%s5016_s0 + $0x30] sm:$0xff]  ;;  %p2638_p1 = scmp.ge.s32.totalorder %s3085_s15, 1 }
  0x4d   : > { %v2682_v58 = vld [vmem:[%s3185_s22 + $0xcc] sm:$0xf]  ;;  %v2506_v59 = vld [vmem:[%s3185_s22 + $0xd8] sm:$0xf0]  ;;  %v2505_v60 = vor.u32 %v2684_v56, %v2504_v55  ;;  %v2488_v62 = vld [vmem:[%s3185_s22 + $0xa8] sm:$0xf] }
  0x4e   : > { %v2509_v61 = vor.u32 %v2682_v58, %v2506_v59  ;;  %v2680_v63 = vld [vmem:[%s3185_s22 + $0xb4] sm:$0xf0]  ;;  %v2678_v0 = vld [vmem:[%s3185_s22 + $0xac] sm:$0xf]  ;;  %v2490_v1 = vld [vmem:[%s3185_s22 + $0xb8] sm:$0xf0] }
  0x4f   : > { %2708 = vmatpush.bf16.msra.mxu2 %v2465_v23  ;;  %561 = vmatpush.bf16.msra.mxu0 %v2465_v23  ;;  %v3252_v2 = vld [vmem:[%s5016_s0] sm:$0xff]  ;;  %v2489_v3 = vor.u32 %v2680_v63, %v2488_v62  ;;  %v2493_v4 = vor.u32 %v2678_v0, %v2490_v1  ;;  %v2472_v5 = vld [vmem:[%s3185_s22 + $0x88] sm:$0xf]  ;;  %v2676_v6 = vld [vmem:[%s3185_s22 + $0x94] sm:$0xf0] }
  0x50   : > { %2716 = vmatpush.bf16.msra.mxu3 %v2469_v24  ;;  %630 = vmatpush.bf16.msra.mxu1 %v2469_v24  ;;  %v2674_v7 = vld [vmem:[%s3185_s22 + $0x8c] sm:$0xf]  ;;  %v2474_v8 = vld [vmem:[%s3185_s22 + $0x98] sm:$0xf0]  ;;  %v2473_v9 = vor.u32 %v2676_v6, %v2472_v5  ;;  %v2456_v12 = vld [vmem:[%s3185_s22 + $0x68] sm:$0xf] }
  0x51   : > { %v2477_v10 = vor.u32 %v2674_v7, %v2474_v8  ;;  %v3263_v11 = vld [vmem:[%s5016_s0 + $0x38] sm:$0xff]  ;;  %v2670_v14 = vld [vmem:[%s3185_s22 + $0x6c] sm:$0xf]  ;;  %v2440_v18 = vld [vmem:[%s3185_s22 + $0x48] sm:$0xf] }
  0x52   : > { %v2672_v13 = vld [vmem:[%s3185_s22 + $0x74] sm:$0xf0]  ;;  %v2458_v16 = vld [vmem:[%s3185_s22 + $0x78] sm:$0xf0]  ;;  %v2646_v17 = vld [vmem:[%s5016_s0 + $0x8] sm:$0xff] }
  0x53   : > { %2709 = vmatpush.bf16.msra.mxu2 %v2449_v29  ;;  %562 = vmatpush.bf16.msra.mxu0 %v2449_v29  ;;  %v2457_v15 = vor.u32 %v2672_v13, %v2456_v12  ;;  %v2461_v19 = vor.u32 %v2670_v14, %v2458_v16  ;;  %v2668_v20 = vld [vmem:[%s3185_s22 + $0x54] sm:$0xf0]  ;;  %v2666_v21 = vld [vmem:[%s3185_s22 + $0x4c] sm:$0xf]  ;;  %v2442_v22 = vld [vmem:[%s3185_s22 + $0x58] sm:$0xf0] }
  0x54   : > { %2717 = vmatpush.bf16.msra.mxu3 %v2453_v30  ;;  %631 = vmatpush.bf16.msra.mxu1 %v2453_v30  ;;  %v2441_v23 = vor.u32 %v2668_v20, %v2440_v18  ;;  %v2445_v24 = vor.u32 %v2666_v21, %v2442_v22  ;;  %v3281_v25 = vld [vmem:[%s5016_s0 + $0x40] sm:$0xff]  ;;  %v2647_v26 = vld [vmem:[%s5016_s0 + $0x10] sm:$0xff]  ;;  %v2424_v27 = vld [vmem:[%s3185_s22 + $0x28] sm:$0xf] }
  0x55   : > { %v2664_v28 = vld [vmem:[%s3185_s22 + $0x34] sm:$0xf0]  ;;  %v2662_v30 = vld [vmem:[%s3185_s22 + $0x2c] sm:$0xf]  ;;  %v2426_v31 = vld [vmem:[%s3185_s22 + $0x38] sm:$0xf0] }
  0x56   : > { %v2425_v29 = vor.u32 %v2664_v28, %v2424_v27  ;;  %v2429_v32 = vor.u32 %v2662_v30, %v2426_v31  ;;  %v3295_v33 = vld [vmem:[%s5016_s0 + $0x48] sm:$0xff]  ;;  %v2648_v34 = vld [vmem:[%s5016_s0 + $0x18] sm:$0xff]  ;;  %v2691_v18 = vld [vmem:[%s3195_s28 + $0x10] sm:$0xff] }
  0x57   : > { %2710 = vmatpush.bf16.msra.mxu2 %v2433_v35  ;;  %563 = vmatpush.bf16.msra.mxu0 %v2433_v35  ;;  %v2408_v35 = vld [vmem:[%s3185_s22 + $0x8] sm:$0xf]  ;;  %v2658_v38 = vld [vmem:[%s3185_s22 + $0xc] sm:$0xf]  ;;  %v2410_v39 = vld [vmem:[%s3185_s22 + $0x18] sm:$0xf0] }
  0x58   : > { %2718 = vmatpush.bf16.msra.mxu3 %v2437_v36  ;;  %632 = vmatpush.bf16.msra.mxu1 %v2437_v36  ;;  %v2660_v36 = vld [vmem:[%s3185_s22 + $0x14] sm:$0xf0]  ;;  %v2413_v40 = vor.u32 %v2658_v38, %v2410_v39  ;;  %v2650_v44 = vld [vmem:[%s5016_s0 + $0x28] sm:$0xff] }
  0x59   : > { %v2409_v37 = vor.u32 %v2660_v36, %v2408_v35  ;;  %v3319_v43 = vld [vmem:[%s5016_s0 + $0x58] sm:$0xff] }
  0x5a   : > { %v2696_v45 = vld [vmem:[%s3195_s28 + $0x38] sm:$0xff] }
  0x5b   : > { %2711 = vmatpush.bf16.msra.mxu2 %v2417_v41  ;;  %564 = vmatpush.bf16.msra.mxu0 %v2417_v41  ;;  %v3309_v41 = vld [vmem:[%s5016_s0 + $0x50] sm:$0xff]  ;;  %v2704_v46 = vld [vmem:[%s3195_s28 + $0x78] sm:$0xff] }
  0x5c   : > { %2719 = vmatpush.bf16.msra.mxu3 %v2421_v42  ;;  %633 = vmatpush.bf16.msra.mxu1 %v2421_v42  ;;  %v2649_v42 = vld [vmem:[%s5016_s0 + $0x20] sm:$0xff]  ;;  %v2692_v6 = vld [vmem:[%s3195_s28 + $0x18] sm:$0xff] }
  0x5d   : > { %v2700_v7 = vld [vmem:[%s3195_s28 + $0x58] sm:$0xff] }
  0x5f   : > { %2712 = vmatpush.bf16.msra.mxu2 %v2401_v51  ;;  %565 = vmatpush.bf16.msra.mxu0 %v2401_v51 }
  0x60   : > { %2720 = vmatpush.bf16.msra.mxu3 %v2405_v52  ;;  %634 = vmatpush.bf16.msra.mxu1 %v2405_v52 }
  0x62   : > { %596 = vmatmul.bf16.vlgmr.msra.gmra.mxu2 %v3239_v57  ;;  %566 = vmatmul.bf16.vlgmr.msra.gmra.mxu0 %v3252_v2 }
  0x63   : > { %696 = vmatpush.bf16.msrb.mxu2 %v2521_v53  ;;  %665 = vmatmul.bf16.vlgmr.msra.gmra.mxu3 %v3239_v57  ;;  %v2695_v53 = vld [vmem:[%s3195_s28 + $0x30] sm:$0xff] }
  0x64   : > { %765 = vmatpush.bf16.msrb.mxu3 %v2525_v54  ;;  %635 = vmatmul.bf16.vlgmr.msra.gmra.mxu1 %v3252_v2  ;;  %v2703_v54 = vld [vmem:[%s3195_s28 + $0x70] sm:$0xff] }
  0x65   : > { %1994 = vmatpush.bf16.msrb.mxu0 %v2696_v45  ;;  %2063 = vmatpush.bf16.msrb.mxu1 %v2704_v46 }
  0x67   : > { %697 = vmatpush.bf16.msrb.mxu2 %v2505_v60  ;;  %v2694_v60 = vld [vmem:[%s3195_s28 + $0x28] sm:$0xff] }
  0x68   : > { %766 = vmatpush.bf16.msrb.mxu3 %v2509_v61  ;;  %v2702_v61 = vld [vmem:[%s3195_s28 + $0x68] sm:$0xff] }
  0x69   : > { %1995 = vmatpush.bf16.msrb.mxu0 %v2695_v53  ;;  %2064 = vmatpush.bf16.msrb.mxu1 %v2703_v54 }
  0x6b   : > { %698 = vmatpush.bf16.msrb.mxu2 %v2489_v3  ;;  %v2693_v3 = vld [vmem:[%s3195_s28 + $0x20] sm:$0xff] }
  0x6c   : > { %767 = vmatpush.bf16.msrb.mxu3 %v2493_v4  ;;  %v2701_v4 = vld [vmem:[%s3195_s28 + $0x60] sm:$0xff] }
  0x6d   : > { %1996 = vmatpush.bf16.msrb.mxu0 %v2694_v60  ;;  %2065 = vmatpush.bf16.msrb.mxu1 %v2702_v61 }
  0x6f   : > { %699 = vmatpush.bf16.msrb.mxu2 %v2473_v9 }
  0x70   : > { %768 = vmatpush.bf16.msrb.mxu3 %v2477_v10 }
  0x71   : > { %1997 = vmatpush.bf16.msrb.mxu0 %v2693_v3  ;;  %2066 = vmatpush.bf16.msrb.mxu1 %v2701_v4  ;;  %v2689_v4 = vld [vmem:[%s3195_s28] sm:$0xff] }
  0x72   : > { %601 = vmatmul.bf16.gmra.mxu2 %v3263_v11  ;;  %571 = vmatmul.bf16.gmra.mxu0 %v2646_v17 }
  0x73   : > { %670 = vmatmul.bf16.gmra.mxu3 %v3263_v11  ;;  %700 = vmatpush.bf16.msrb.mxu2 %v2457_v15 }
  0x74   : > { %769 = vmatpush.bf16.msrb.mxu3 %v2461_v19  ;;  %640 = vmatmul.bf16.gmra.mxu1 %v2646_v17  ;;  %v2699_v19 = vld [vmem:[%s3195_s28 + $0x50] sm:$0xff] }
  0x75   : > { %1998 = vmatpush.bf16.msrb.mxu0 %v2692_v6  ;;  %2067 = vmatpush.bf16.msrb.mxu1 %v2700_v7  ;;  %v2697_v6 = vld [vmem:[%s3195_s28 + $0x40] sm:$0xff] }
  0x77   : > { %701 = vmatpush.bf16.msrb.mxu2 %v2441_v23 }
  0x78   : > { %770 = vmatpush.bf16.msrb.mxu3 %v2445_v24 }
  0x79   : > { %1999 = vmatpush.bf16.msrb.mxu0 %v2691_v18  ;;  %2068 = vmatpush.bf16.msrb.mxu1 %v2699_v19 }
  0x7b   : > { %702 = vmatpush.bf16.msrb.mxu2 %v2425_v29 }
  0x7c   : > { %771 = vmatpush.bf16.msrb.mxu3 %v2429_v32 }
  0x7f   : > { %703 = vmatpush.bf16.msrb.mxu2 %v2409_v37 }
  0x80   : > { %772 = vmatpush.bf16.msrb.mxu3 %v2413_v40  ;;  %v2698_v40 = vld [vmem:[%s3195_s28 + $0x48] sm:$0xff] }
  0x81   : > { %2069 = vmatpush.bf16.msrb.mxu1 %v2698_v40 }
  0x82   : > { %606 = vmatmul.bf16.gmra.mxu2 %v3281_v25  ;;  %576 = vmatmul.bf16.gmra.mxu0 %v2647_v26 }
  0x83   : > { %675 = vmatmul.bf16.gmra.mxu3 %v3281_v25 }
  0x84   : > { %645 = vmatmul.bf16.gmra.mxu1 %v2647_v26 }
  0x85   : > { %2070 = vmatpush.bf16.msrb.mxu1 %v2697_v6 }
  0x92   : > { %611 = vmatmul.bf16.gmra.mxu2 %v3295_v33  ;;  %581 = vmatmul.bf16.gmra.mxu0 %v2648_v34 }
  0x93   : > { %680 = vmatmul.bf16.gmra.mxu3 %v3295_v33 }
  0x94   : > { %650 = vmatmul.bf16.gmra.mxu1 %v2648_v34 }
  0xa2   : > { %616 = vmatmul.bf16.gmra.mxu2 %v3309_v41  ;;  %586 = vmatmul.bf16.gmra.mxu0 %v2649_v42 }
  0xa3   : > { %685 = vmatmul.bf16.gmra.mxu3 %v3309_v41 }
  0xa4   : > { %655 = vmatmul.bf16.gmra.mxu1 %v2649_v42 }
  0xb2   : > { %621 = vmatmul.bf16.gmra.mxu2 %v3319_v43  ;;  %591 = vmatmul.bf16.gmra.mxu0 %v2650_v44 }
  0xb3   : > { %690 = vmatmul.bf16.gmra.mxu3 %v3319_v43 }
  0xb4   : > { %660 = vmatmul.bf16.gmra.mxu1 %v2650_v44 }
  0xc2   : > { %704 = vmatmul.bf16.vlgmr.msrb.gmra.mxu2 %v3252_v2 }
  0xc3   : > { %773 = vmatmul.bf16.vlgmr.msrb.gmra.mxu3 %v3252_v2 }
  0xd2   : > { %709 = vmatmul.bf16.gmra.mxu2 %v2646_v17 }
  0xd3   : > { %778 = vmatmul.bf16.gmra.mxu3 %v2646_v17 }
  0xdf   : > { %v3358_v0 = vpop.f32.mrf.mxu0 }
  0xe0   : > { %v2526_v21 = vmul.f32 -1.442695, %v3358_v0 }
  0xe1   : > { %v3366_v5 = vpop.f32.mrf.mxu1 }
  0xe2   : > { %714 = vmatmul.bf16.gmra.mxu2 %v2647_v26 }
  0xe3   : > { %783 = vmatmul.bf16.gmra.mxu3 %v2647_v26 }
  0xe5   : > { %v3330_v47 = vpop.f32.mrf.mxu2 }
  0xe6   : > { %v3332_v48 = vpop.f32.mrf.mxu3  ;;  %v2550_v12 = vmul.f32 -1.442695, %v3330_v47 }
  0xe7   : > { %5051 = vst [vmem:[#allocation9_spill] sm:$0xff] %v3332_v48  ;;  %v3370_v8 = vpop.f32.mrf.mxu0  ;;  %v2551_v14 = vmul.f32 -1.442695, %v3332_v48 }
  0xe8   : > { %2789 = vpow2.f32 %v2550_v12  ;;  %v2528_v61 = vmul.f32 -1.442695, %v3370_v8 }
  0xe9   : > { %v3378_v13 = vpop.f32.mrf.mxu1  ;;  %2791 = vpow2.f32 %v2551_v14 }
  0xea   : > { %2793 = vpow2.f32 %v2526_v21 }
  0xed   : > { %v3334_v49 = vpop.f32.mrf.mxu2 }
  0xee   : > { %5052 = vst [vmem:[#allocation10_spill] sm:$0xff] %v3334_v49  ;;  %v3336_v50 = vpop.f32.mrf.mxu3  ;;  %v2790_v20 = vpop.eup %2789 }
  0xef   : > { %5053 = vst [vmem:[#allocation11_spill] sm:$0xff] %v3336_v50  ;;  %v3382_v15 = vpop.f32.mrf.mxu0  ;;  %v2792_v23 = vpop.eup %2791  ;;  %v3394_v24 = vadd.f32 1.0, %v2790_v20  ;;  %v2553_v37 = vmul.f32 -1.442695, %v3336_v50 }
  0xf0   : > { %v2530_v26 = vmul.f32 -1.442695, %v3382_v15  ;;  %v3404_v30 = vadd.f32 1.0, %v2792_v23  ;;  %v2794_v32 = vpop.eup %2793 }
  0xf1   : > { %v3391_v22 = vpop.f32.mrf.mxu1  ;;  %v3416_v39 = vadd.f32 1.0, %v2794_v32  ;;  %vm1391_vm0 = vweird.f32 %v3394_v24 }
  0xf2   : > { %719 = vmatmul.bf16.gmra.mxu2 %v2648_v34  ;;  %v2531_v31 = vmul.f32 -1.442695, %v3391_v22  ;;  %v1412_v32 = vand.u32 2147483648, %v3404_v30  ;;  %vm1406_vm1 = vweird.f32 %v3404_v30 }
  0xf3   : > { %788 = vmatmul.bf16.gmra.mxu3 %v2648_v34  ;;  %v2552_v34 = vmul.f32 -1.442695, %v3334_v49  ;;  %vm1031_vm7 = vweird.f32 %v3416_v39 }
  0xf5   : > { %v3338_v51 = vpop.f32.mrf.mxu2 }
  0xf6   : > { %5054 = vst [vmem:[#allocation12_spill] sm:$0xff] %v3338_v51  ;;  %v3340_v52 = vpop.f32.mrf.mxu3  ;;  %v2554_v14 = vmul.f32 -1.442695, %v3338_v51 }
  0xf7   : > { %5055 = vst [vmem:[#allocation13_spill] sm:$0xff] %v3340_v52  ;;  %v3397_v27 = vpop.f32.mrf.mxu0 }
  0xf9   : > { %v3411_v35 = vpop.f32.mrf.mxu1 }
  0xfd   : > { %v3344_v55 = vpop.f32.mrf.mxu2 }
  0xfe   : > { %5056 = vst [vmem:[#allocation14_spill] sm:$0xff] %v3344_v55  ;;  %v3346_v56 = vpop.f32.mrf.mxu3 }
  0xff   : > { %5057 = vst [vmem:[#allocation15_spill] sm:$0xff] %v3346_v56  ;;  %v3422_v45 = vpop.f32.mrf.mxu0  ;;  %v3528_v51 = vmul.f32 -1.442695, %v3346_v56 }
 0x100   : > { %v2534_v20 = vmul.f32 -1.442695, %v3422_v45 }
 0x101   : > { %v3443_v21 = vpop.f32.mrf.mxu1 }
 0x102   : > { %724 = vmatmul.bf16.gmra.mxu2 %v2649_v42 }
 0x103   : > { %793 = vmatmul.bf16.gmra.mxu3 %v2649_v42 }
 0x105   : > { %v3348_v58 = vpop.f32.mrf.mxu2 }
 0x106   : > { %v3350_v59 = vpop.f32.mrf.mxu3 }
 0x107   : > { %5058 = vst [vmem:[#allocation16_spill] sm:$0xff] %v3350_v59 }
 0x10d   : > { %v3354_v62 = vpop.f32.mrf.mxu2 }
 0x10e   : > { %5059 = vst [vmem:[#allocation17_spill] sm:$0xff] %v3354_v62  ;;  %v3356_v63 = vpop.f32.mrf.mxu3 }
 0x10f   : > { %5060 = vst [vmem:[#allocation18_spill] sm:$0xff] %v3356_v63 }
 0x112   : > { %729 = vmatmul.bf16.gmra.mxu2 %v2650_v44 }
 0x113   : > { %798 = vmatmul.bf16.gmra.mxu3 %v2650_v44 }
 0x115   : > { %v3360_v1 = vpop.f32.mrf.mxu2 }
 0x116   : > { %5061 = vst [vmem:[#allocation19_spill] sm:$0xff] %v3360_v1  ;;  %v3362_v2 = vpop.f32.mrf.mxu3 }
 0x117   : > { %5062 = vst [vmem:[#allocation20_spill] sm:$0xff] %v3362_v2 }
 0x11d   : > { %v3372_v9 = vpop.f32.mrf.mxu2 }
 0x11e   : > { %5063 = vst [vmem:[#allocation21_spill] sm:$0xff] %v3372_v9  ;;  %v3374_v10 = vpop.f32.mrf.mxu3 }
 0x11f   : > { %5064 = vst [vmem:[#allocation22_spill] sm:$0xff] %v3374_v10 }
 0x122   : > { %734 = vmatmul.bf16.gmra.mxu2 %v3239_v57 }
 0x123   : > { %803 = vmatmul.bf16.gmra.mxu3 %v3239_v57  ;;  %v2527_v57 = vmul.f32 -1.442695, %v3366_v5 }
 0x125   : > { %v3384_v16 = vpop.f32.mrf.mxu2  ;;  %2795 = vpow2.f32 %v2527_v57 }
 0x126   : > { %5065 = vst [vmem:[#allocation23_spill] sm:$0xff] %v3384_v16  ;;  %v3386_v17 = vpop.f32.mrf.mxu3  ;;  %2797 = vrcp.f32 %v3394_v24  ;;  %v2533_v16 = vmul.f32 -1.442695, %v3411_v35 }
 0x127   : > { %5066 = vst [vmem:[#allocation24_spill] sm:$0xff] %v3386_v17  ;;  %2799 = vpow2.f32 %v2530_v26  ;;  %v1395_v26 = vand.u32 2147483647, %v3394_v24  ;;  %v3504_v17 = vpop.f32.mrf.mxu1 }
 0x128   : > { %2801 = vrcp.f32 %v3404_v30 }
 0x129   : > { %2803 = vpow2.f32 %v2531_v31  ;;  %v1397_v31 = vand.u32 2147483648, %v3394_v24  ;;  %vm3473_vm2 = vcmp.eq.f32.partialorder %v1395_v26, 8.507059e+37 }
 0x12a   : > { %2805 = vpow2.f32 %v2552_v34  ;;  %v2529_v34 = vmul.f32 -1.442695, %v3378_v13 }
 0x12b   : > { %v2796_v36 = vpop.eup %2795  ;;  %2807 = vpow2.f32 %v2553_v37 }
 0x12c   : > { %v3414_v38 = vpop.eup %2797  ;;  %v3420_v44 = vadd.f32 1.0, %v2796_v36  ;;  %2809 = vrcp.f32 %v3416_v39 }
 0x12d   : > { %v3399_v28 = vpop.f32.mrf.mxu2  ;;  %v2800_v42 = vpop.eup %2799  ;;  %v1387_v60 = vmul.f32 %v3414_v38, %v3394_v24  ;;  %vm1392_vm3 = vweird.f32 %v3414_v38 }
 0x12e   : > { %5067 = vst [vmem:[#allocation25_spill] sm:$0xff] %v3399_v28  ;;  %v3401_v29 = vpop.f32.mrf.mxu3  ;;  %v3428_v54 = vpop.eup %2801  ;;  %v3434_v3 = vadd.f32 1.0, %v2800_v42  ;;  %2811 = vrcp.f32 %v3420_v44  ;;  %vm3512_vm6 = vmor %vm1391_vm0, %vm1392_vm3  ;;  %vm1046_vm11 = vweird.f32 %v3420_v44 }
 0x12f   : > { %5068 = vst [vmem:[#allocation26_spill] sm:$0xff] %v3401_v29  ;;  %v2804_v7 = vpop.eup %2803  ;;  %v1402_v12 = vmul.f32 %v3428_v54, %v3404_v30  ;;  %v1388_v19 = vsub.f32 1.0, %v1387_v60  ;;  %2813 = vpow2.f32 %v2528_v61  ;;  %v2535_v60 = vmul.f32 -1.442695, %v3443_v21  ;;  %v3463_v61 = vpop.f32.mrf.mxu0 }
 0x130   : > { %v2806_v18 = vpop.eup %2805  ;;  %2815 = vrcp.f32 %v3434_v3  ;;  %v3446_v57 = vadd.f32 1.0, %v2804_v7  ;;  %vm1407_vm4 = vweird.f32 %v3428_v54  ;;  %vm1091_vm0 = vweird.f32 %v3434_v3 }
 0x131   : > { %v2808_v23 = vpop.eup %2807  ;;  %v1403_v37 = vsub.f32 1.0, %v1402_v12  ;;  %2817 = vpow2.f32 %v2554_v14  ;;  %v1389_v42 = vmul.f32 %v3414_v38, %v1388_v19  ;;  %v3477_v19 = vor.u32 1.1754944e-38, %v1412_v32  ;;  %vm3539_vm8 = vmor %vm1406_vm1, %vm1407_vm4 }
 0x132   : > { %739 = vmatmul.bf16.gmra.mxu2 %v3263_v11  ;;  %v3454_v36 = vpop.eup %2809  ;;  %2819 = vpow2.f32 %v2534_v20  ;;  %v1052_v14 = vand.u32 2147483648, %v3420_v44  ;;  %vm1106_vm3 = vweird.f32 %v3446_v57 }
 0x133   : > { %808 = vmatmul.bf16.gmra.mxu3 %v3263_v11  ;;  %v2690_v11 = vld [vmem:[%s3195_s28 + $0x8] sm:$0xff]  ;;  %2821 = vrcp.f32 %v3446_v57  ;;  %v1027_v20 = vmul.f32 %v3454_v36, %v3416_v39  ;;  %vm1032_vm10 = vweird.f32 %v3454_v36 }
 0x134   : > { %2000 = vmatpush.bf16.msrb.mxu0 %v2690_v11  ;;  %v3456_v11 = vadd.f32 1.0, %v2806_v18  ;;  %v3458_v40 = vpop.eup %2811  ;;  %v1398_v18 = vor.u32 1.1754944e-38, %v1397_v31  ;;  %2823 = vpow2.f32 %v2529_v34  ;;  %v2556_v31 = vmul.f32 -1.442695, %v3344_v55  ;;  %vm3597_vm13 = vmor %vm1031_vm7, %vm1032_vm10 }
 0x135   : > { %v3424_v46 = vpop.f32.mrf.mxu2  ;;  %v2814_v12 = vpop.eup %2813  ;;  %v1042_v26 = vmul.f32 %v3458_v40, %v3420_v44  ;;  %v1037_v34 = vand.u32 2147483648, %v3416_v39  ;;  %v1028_v28 = vsub.f32 1.0, %v1027_v20  ;;  %vm1047_vm12 = vweird.f32 %v3458_v40 }
 0x136   : > { %5069 = vst [vmem:[#allocation27_spill] sm:$0xff] %v3424_v46  ;;  %v3426_v53 = vpop.f32.mrf.mxu3  ;;  %v1404_v46 = vmul.f32 %v3428_v54, %v1403_v37  ;;  %2825 = vrcp.f32 %v3456_v11  ;;  %v3494_v37 = vadd.f32 1.0, %v2814_v12  ;;  %vm3606_vm14 = vmor %vm1046_vm11, %vm1047_vm12 }
 0x137   : > { %5070 = vst [vmem:[#allocation28_spill] sm:$0xff] %v3426_v53  ;;  %v3481_v53 = vpop.eup %2815  ;;  %2827 = vpow2.f32 %v2535_v60  ;;  %v2532_v60 = vmul.f32 -1.442695, %v3397_v27  ;;  %v1043_v20 = vsub.f32 1.0, %v1042_v26 }
 0x138   : > { %2001 = vmatpush.bf16.msrb.mxu0 %v2689_v4  ;;  %5071 = vst [vmem:[#allocation29_spill] sm:$0xff] %v3456_v11  ;;  %v2555_v4 = vmul.f32 -1.442695, %v3340_v52  ;;  %v2818_v32 = vpop.eup %2817  ;;  %v1087_v55 = vmul.f32 %v3481_v53, %v3434_v3  ;;  %v1405_v12 = vadd.f32 %v3428_v54, %v1404_v46  ;;  %v3530_v46 = vor.u32 1.1754944e-38, %v1037_v34 }
 0x139   : > { %v3522_v52 = vadd.f32 1.0, %v2818_v32  ;;  %vm1092_vm1 = vweird.f32 %v3481_v53 }
 0x13a   : > { %2829 = vpow2.f32 %v2555_v4  ;;  %v1088_v32 = vsub.f32 1.0, %v1087_v55 }
 0x13d   : > { %v3469_v6 = vpop.f32.mrf.mxu2 }
 0x13e   : > { %5072 = vst [vmem:[#allocation30_spill] sm:$0xff] %v3469_v6  ;;  %v3471_v7 = vpop.f32.mrf.mxu3  ;;  %v3485_v6 = vadd.f32 1.0, %v2808_v23  ;;  %v2820_v23 = vpop.eup %2819 }
 0x13f   : > { %5073 = vst [vmem:[#allocation31_spill] sm:$0xff] %v3471_v7  ;;  %v1390_v7 = vadd.f32 %v3414_v38, %v1389_v42  ;;  %v1035_v42 = vand.u32 2147483647, %v3416_v39  ;;  %v3506_v4 = vpop.eup %2821  ;;  %v3533_v26 = vadd.f32 1.0, %v2820_v23  ;;  %v3550_v23 = vpop.f32.mrf.mxu0  ;;  %v1053_v39 = vor.u32 1.1754944e-38, %v1052_v14 }
 0x140   : > { %5076 = vst [vmem:[#allocation32_spill] sm:$0xff] %v3485_v6  ;;  %2831 = vrcp.f32 %v3485_v6  ;;  %v2824_v50 = vpop.eup %2823  ;;  %v1102_v34 = vmul.f32 %v3506_v4, %v3446_v57  ;;  %vm1107_vm4 = vweird.f32 %v3506_v4 }
 0x141   : > { %v1394_v10 = vsel %vm3512_vm6, %v3414_v38, %v1390_v7  ;;  %2833 = vpow2.f32 %v2556_v31  ;;  %v3525_v24 = vpop.eup %2825  ;;  %v1029_v7 = vmul.f32 %v3454_v36, %v1028_v28  ;;  %vm3544_vm9 = vcmp.eq.f32.partialorder %v1035_v42, 8.507059e+37  ;;  %vm3679_vm6 = vmor %vm1106_vm3, %vm1107_vm4 }
 0x142   : > { %744 = vmatmul.bf16.gmra.mxu2 %v3281_v25  ;;  %5081 = vst [vmem:[#allocation33_spill] sm:$0xff] %v3525_v24  ;;  %2835 = vrcp.f32 %v3494_v37  ;;  %v2828_v49 = vpop.eup %2827  ;;  %v1409_v28 = vsel %vm3539_vm8, %v3428_v54, %v1405_v12  ;;  %v1044_v42 = vmul.f32 %v3458_v40, %v1043_v20  ;;  %v1089_v12 = vmul.f32 %v3481_v53, %v1088_v32 }
 0x143   : > { %813 = vmatmul.bf16.gmra.mxu3 %v3281_v25  ;;  %v1410_v25 = vand.u32 2147483647, %v3404_v30  ;;  %2837 = vpow2.f32 %v2532_v60  ;;  %v1399_v30 = vsel %vm3473_vm2, %v1398_v18, %v1394_v10  ;;  %v1050_v60 = vand.u32 2147483647, %v3420_v44  ;;  %vm3637_vm2 = vmor %vm1091_vm0, %vm1092_vm1 }
 0x144   : > { %2839 = vpow2.f32 %v2533_v16  ;;  %v3573_v16 = vadd.f32 1.0, %v2828_v49  ;;  %v1030_v18 = vadd.f32 %v3454_v36, %v1029_v7  ;;  %v1103_v20 = vsub.f32 1.0, %v1102_v34 }
 0x145   : > { %vm3496_vm5 = vcmp.eq.f32.partialorder %v1410_v25, 8.507059e+37  ;;  %v3552_v25 = vpop.eup %2829  ;;  %v3560_v56 = vpop.f32.mrf.mxu2  ;;  %2841 = vrcp.f32 %v3522_v52  ;;  %v2538_v38 = vmul.f32 -1.442695, %v3550_v23  ;;  %v3585_v9 = vmul.f32 %v1399_v30, %v3330_v47 }
 0x146   : > { %v3562_v55 = vpop.f32.mrf.mxu3  ;;  %v3568_v10 = vpop.eup %2831  ;;  %2843 = vrcp.f32 %v3533_v26  ;;  %v3590_v49 = vsel %vm3496_vm5, %v3477_v19, %v1409_v28  ;;  %vm3610_vm15 = vcmp.eq.f32.partialorder %v1050_v60, 8.507059e+37  ;;  %v3618_v30 = vadd.f32 1.0, %v2824_v50 }
 0x147   : > { %5086 = vst [vmem:[#allocation34_spill] sm:$0xff] %v3568_v10  ;;  %v3576_v54 = vpop.eup %2833  ;;  %v3616_v19 = vpop.f32.mrf.mxu1  ;;  %v1095_v44 = vand.u32 2147483647, %v3434_v3  ;;  %v1097_v28 = vand.u32 2147483648, %v3434_v3  ;;  %2845 = vrcp.f32 %v3573_v16  ;;  %v1034_v60 = vsel %vm3597_vm13, %v3454_v36, %v1030_v18 }
 0x148   : > { %v3582_v48 = vpop.eup %2835  ;;  %5087 = vst [vmem:[#allocation35_spill] sm:$0xff] %v3585_v9  ;;  %v1090_v14 = vadd.f32 %v3481_v53, %v1089_v12  ;;  %v1104_v2 = vmul.f32 %v3506_v4, %v1103_v20  ;;  %2847 = vpow2.f32 %v2538_v38  ;;  %v1110_v36 = vand.u32 2147483647, %v3446_v57  ;;  %v3649_v38 = vpop.f32.mrf.mxu0 }
 0x149   : > { %5088 = vst [vmem:[#allocation36_spill] sm:$0xff] %v3590_v49  ;;  %v2838_v32 = vpop.eup %2837  ;;  %v1112_v12 = vand.u32 2147483648, %v3446_v57  ;;  %v1057_v3 = vmul.f32 %v3582_v48, %v3494_v37  ;;  %2849 = vrcp.f32 %v3618_v30  ;;  %vm3657_vm5 = vcmp.eq.f32.partialorder %v1095_v44, 8.507059e+37 }
 0x14a   : > { %v2840_v34 = vpop.eup %2839  ;;  %v3643_v18 = vadd.f32 1.0, %v2838_v32  ;;  %v1105_v1 = vadd.f32 %v3506_v4, %v1104_v2  ;;  %v2536_v2 = vmul.f32 -1.442695, %v3463_v61  ;;  %vm3686_vm7 = vcmp.eq.f32.partialorder %v1110_v36, 8.507059e+37 }
 0x14b   : > { %v3647_v20 = vadd.f32 1.0, %v2840_v34  ;;  %v1094_v34 = vsel %vm3637_vm2, %v3481_v53, %v1090_v14  ;;  %v1058_v31 = vsub.f32 1.0, %v1057_v3  ;;  %v2539_v53 = vmul.f32 -1.442695, %v3616_v19 }
 0x14c   : > { %2851 = vrcp.f32 %v3643_v18  ;;  %v1113_v29 = vor.u32 1.1754944e-38, %v1112_v12  ;;  %vm1061_vm8 = vweird.f32 %v3494_v37  ;;  %v1109_v36 = vsel %vm3679_vm6, %v3506_v4, %v1105_v1 }
 0x14d   : > { %v3661_v32 = vpop.f32.mrf.mxu2  ;;  %2853 = vrcp.f32 %v3647_v20  ;;  %v1059_v57 = vmul.f32 %v3582_v48, %v1058_v31  ;;  %v1157_v12 = vand.u32 2147483648, %v3533_v26  ;;  %v1065_v10 = vand.u32 2147483647, %v3494_v37 }
 0x14e   : > { %v3663_v47 = vpop.f32.mrf.mxu3  ;;  %2855 = vpow2.f32 %v2539_v53  ;;  %vm1151_vm11 = vweird.f32 %v3533_v26  ;;  %vm1076_vm0 = vweird.f32 %v3618_v30  ;;  %v1082_v6 = vand.u32 2147483648, %v3618_v30 }
 0x14f   : > { %v3703_v31 = vpop.f32.mrf.mxu1  ;;  %2857 = vpow2.f32 %v2536_v2  ;;  %v1060_v4 = vadd.f32 %v3582_v48, %v1059_v57  ;;  %vm3752_vm13 = vcmp.eq.f32.partialorder %v1065_v10, 8.507059e+37  ;;  %v1080_v10 = vand.u32 2147483647, %v3618_v30 }
 0x150   : > { %v3740_v57 = vpop.f32.mrf.mxu0  ;;  %v1083_v62 = vor.u32 1.1754944e-38, %v1082_v6 }
 0x152   : > { %749 = vmatmul.bf16.gmra.mxu2 %v3295_v33 }
 0x153   : > { %818 = vmatmul.bf16.gmra.mxu3 %v3295_v33  ;;  %v1045_v33 = vadd.f32 %v3458_v40, %v1044_v42  ;;  %v3623_v42 = vpop.eup %2841 }
 0x154   : > { %5095 = vst [vmem:[#allocation37_spill] sm:$0xff] %v3623_v42  ;;  %v3630_v9 = vpop.eup %2843  ;;  %v2542_v42 = vmul.f32 -1.442695, %v3740_v57 }
 0x155   : > { %v1049_v50 = vsel %vm3606_vm14, %v3458_v40, %v1045_v33  ;;  %v1039_v40 = vsel %vm3544_vm9, %v3530_v46, %v1034_v60  ;;  %v1098_v33 = vor.u32 1.1754944e-38, %v1097_v28  ;;  %v1147_v46 = vmul.f32 %v3630_v9, %v3533_v26  ;;  %v3671_v60 = vpop.eup %2845 }
 0x156   : > { %v1054_v44 = vsel %vm3610_vm15, %v1053_v39, %v1049_v50  ;;  %v2848_v49 = vpop.eup %2847  ;;  %v2537_v50 = vmul.f32 -1.442695, %v3504_v17  ;;  %vm1062_vm9 = vweird.f32 %v3582_v48  ;;  %v1162_v63 = vmul.f32 %v3671_v60, %v3573_v16 }
 0x157   : > { %v1099_v39 = vsel %vm3657_vm5, %v1098_v33, %v1094_v34  ;;  %v1148_v3 = vsub.f32 1.0, %v1147_v46  ;;  %v3705_v7 = vpop.eup %2849  ;;  %v1155_v33 = vand.u32 2147483647, %v3533_v26  ;;  %v3708_v34 = vadd.f32 1.0, %v2848_v49  ;;  %vm3720_vm10 = vmor %vm1061_vm8, %vm1062_vm9 }
 0x158   : > { %v1746_v28 = vmul.f32 %v1039_v40, %v3358_v0  ;;  %v3713_v1 = vmul.f32 %v1054_v44, %v3366_v5  ;;  %v3724_v49 = vpop.eup %2851  ;;  %v3727_v53 = vmul.f32 %v1099_v39, %v3382_v15  ;;  %v3731_v0 = vsel %vm3686_vm7, %v1113_v29, %v1109_v36 }
 0x159   : > { %2859 = vpow2.f32 %v2537_v50  ;;  %v3735_v5 = vpop.eup %2853  ;;  %v1149_v40 = vmul.f32 %v3630_v9, %v1148_v3  ;;  %v3738_v44 = vor.u32 1.1754944e-38, %v1157_v12  ;;  %v1163_v2 = vsub.f32 1.0, %v1162_v63 }
 0x15a   : > { %v1067_v15 = vand.u32 2147483648, %v3494_v37  ;;  %vm3744_vm12 = vcmp.eq.f32.partialorder %v1155_v33, 8.507059e+37  ;;  %2861 = vrcp.f32 %v3708_v34  ;;  %v1064_v29 = vsel %vm3720_vm10, %v3582_v48, %v1060_v4  ;;  %v3758_v37 = vpop.f32.mrf.mxu2  ;;  %v2856_v3 = vpop.eup %2855 }
 0x15b   : > { %v1072_v63 = vmul.f32 %v3705_v7, %v3618_v30  ;;  %vm1152_vm14 = vweird.f32 %v3630_v9  ;;  %vm1166_vm15 = vweird.f32 %v3573_v16  ;;  %v1170_v50 = vand.u32 2147483647, %v3573_v16  ;;  %v2858_v12 = vpop.eup %2857 }
 0x15c   : > { %v1068_v36 = vor.u32 1.1754944e-38, %v1067_v15  ;;  %vm1077_vm1 = vweird.f32 %v3705_v7  ;;  %v1164_v33 = vmul.f32 %v3671_v60, %v1163_v2  ;;  %v1172_v4 = vand.u32 2147483648, %v3573_v16  ;;  %vm3778_vm2 = vmor %vm1151_vm11, %vm1152_vm14  ;;  %v3834_v16 = vpop.f32.mrf.mxu0 }
 0x15d   : > { %v1073_v48 = vsub.f32 1.0, %v1072_v63  ;;  %v1150_v15 = vadd.f32 %v3630_v9, %v1149_v40  ;;  %v2540_v2 = vmul.f32 -1.442695, %v3649_v38  ;;  %vm1167_vm3 = vweird.f32 %v3671_v60  ;;  %vm3795_vm4 = vmor %vm1076_vm0, %vm1077_vm1 }
 0x15e   : > { %v1069_v46 = vsel %vm3752_vm13, %v1068_v36, %v1064_v29  ;;  %v3786_v29 = vadd.f32 1.0, %v2856_v3  ;;  %v2541_v40 = vmul.f32 -1.442695, %v3703_v31  ;;  %v3789_v36 = vpop.f32.mrf.mxu1  ;;  %vm1081_vm5 = vcmp.eq.f32.partialorder %v1080_v10, 8.507059e+37  ;;  %vm3820_vm7 = vmor %vm1166_vm15, %vm1167_vm3 }
 0x15f   : > { %v2860_v24 = vpop.eup %2859  ;;  %v1748_v11 = vmul.f32 %v1069_v46, %v3370_v8  ;;  %v1074_v39 = vmul.f32 %v3705_v7, %v1073_v48  ;;  %v1794_v48 = vmul.f32 %v1746_v28, %v3560_v56  ;;  %v1165_v59 = vadd.f32 %v3671_v60, %v1164_v33 }
 0x160   : > { %v3799_v8 = vpop.eup %2861  ;;  %vm3805_vm6 = vcmp.eq.f32.partialorder %v1170_v50, 8.507059e+37  ;;  %v3809_v30 = vadd.f32 1.0, %v2858_v12  ;;  %v1117_v6 = vmul.f32 %v3724_v49, %v3643_v18  ;;  %v1154_v56 = vsel %vm3778_vm2, %v3630_v9, %v1150_v15 }
 0x161   : > { %v1796_v3 = vmul.f32 %v1748_v11, %v3661_v32  ;;  %v1075_v46 = vadd.f32 %v3705_v7, %v1074_v39  ;;  %2863 = vpow2.f32 %v2540_v2  ;;  %v1207_v9 = vmul.f32 %v3799_v8, %v3708_v34 }
 0x162   : > { %754 = vmatmul.bf16.gmra.mxu2 %v3309_v41  ;;  %v3827_v50 = vpop.f32.mrf.mxu2  ;;  %2865 = vrcp.f32 %v3786_v29  ;;  %v1118_v33 = vsub.f32 1.0, %v1117_v6  ;;  %v1173_v15 = vor.u32 1.1754944e-38, %v1172_v4  ;;  %v3836_v63 = vadd.f32 1.0, %v2860_v24 }
 0x163   : > { %823 = vmatmul.bf16.gmra.mxu3 %v3309_v41  ;;  %v3760_v41 = vpop.f32.mrf.mxu3  ;;  %v1842_v32 = vpack.c.bf16 %v1796_v3, %v1794_v48  ;;  %v1079_v28 = vsel %vm3795_vm4, %v3705_v7, %v1075_v46  ;;  %2867 = vpow2.f32 %v2541_v40  ;;  %v1159_v7 = vsel %vm3744_vm12, %v3738_v44, %v1154_v56 }
 0x164   : > { %v1084_v12 = vsel %vm1081_vm5, %v1083_v62, %v1079_v28  ;;  %v1169_v39 = vsel %vm3820_vm7, %v3671_v60, %v1165_v59  ;;  %v1119_v26 = vmul.f32 %v3724_v49, %v1118_v33  ;;  %vm1121_vm8 = vweird.f32 %v3643_v18 }
 0x165   : > { %v1749_v2 = vmul.f32 %v1084_v12, %v3378_v13  ;;  %2002 = vmatmul.bf16.vlgmr.msrb.gmra.mxu0 %v1842_v32  ;;  %v1217_v62 = vand.u32 2147483648, %v3708_v34  ;;  %v1795_v24 = vmul.f32 %v3713_v1, %v3562_v55  ;;  %vm1122_vm9 = vweird.f32 %v3724_v49 }
 0x166   : > { %2869 = vrcp.f32 %v3809_v30  ;;  %v1208_v44 = vsub.f32 1.0, %v1207_v9  ;;  %v1120_v14 = vadd.f32 %v3724_v49, %v1119_v26  ;;  %v1125_v59 = vand.u32 2147483647, %v3643_v18  ;;  %vm3860_vm10 = vmor %vm1121_vm8, %vm1122_vm9  ;;  %v3877_v46 = vpop.f32.mrf.mxu1 }
 0x167   : > { %v1797_v13 = vmul.f32 %v1749_v2, %v3663_v47  ;;  %v2864_v60 = vpop.eup %2863  ;;  %v3857_v4 = vmul.f32 %v3731_v0, %v3391_v22  ;;  %2871 = vrcp.f32 %v3836_v63  ;;  %v1127_v47 = vand.u32 2147483648, %v3643_v18 }
 0x168   : > { %v3866_v1 = vpop.eup %2865  ;;  %v3869_v48 = vmul.f32 %v1159_v7, %v3422_v45  ;;  %v3873_v22 = vsel %vm3805_vm6, %v1173_v15, %v1169_v39  ;;  %v1215_v0 = vand.u32 2147483647, %v3708_v34  ;;  %v2544_v3 = vmul.f32 -1.442695, %v3834_v16  ;;  %v3905_v39 = vpop.f32.mrf.mxu0 }
 0x169   : > { %v1843_v40 = vpack.c.bf16 %v1797_v13, %v1795_v24  ;;  %v2868_v18 = vpop.eup %2867  ;;  %vm1211_vm11 = vweird.f32 %v3708_v34  ;;  %v3881_v6 = vor.u32 1.1754944e-38, %v1217_v62  ;;  %v1230_v45 = vand.u32 2147483647, %v3786_v29 }
 0x16a   : > { %v1232_v56 = vand.u32 2147483648, %v3786_v29  ;;  %v3886_v11 = vpop.f32.mrf.mxu2  ;;  %v1209_v28 = vmul.f32 %v3799_v8, %v1208_v44  ;;  %v3891_v9 = vadd.f32 1.0, %v2864_v60  ;;  %vm1126_vm12 = vcmp.eq.f32.partialorder %v1125_v59, 8.507059e+37 }
 0x16b   : > { %v3829_v10 = vpop.f32.mrf.mxu3  ;;  %2071 = vmatmul.bf16.vlgmr.msrb.gmra.mxu1 %v1843_v40  ;;  %vm1212_vm13 = vweird.f32 %v3799_v8  ;;  %v1222_v12 = vmul.f32 %v3866_v1, %v3786_v29  ;;  %v1128_v33 = vor.u32 1.1754944e-38, %v1127_v47  ;;  %v1132_v15 = vmul.f32 %v3735_v5, %v3647_v20 }
 0x16c   : > { %v3901_v2 = vpop.eup %2869  ;;  %v3903_v7 = vadd.f32 1.0, %v2868_v18  ;;  %2873 = vpow2.f32 %v2544_v3  ;;  %vm1136_vm14 = vweird.f32 %v3647_v20  ;;  %vm1137_vm15 = vweird.f32 %v3735_v5  ;;  %vm3959_vm4 = vmor %vm1211_vm11, %vm1212_vm13 }
 0x16d   : > { %v1133_v62 = vsub.f32 1.0, %v1132_v15  ;;  %v1140_v24 = vand.u32 2147483647, %v3647_v20  ;;  %v1142_v13 = vand.u32 2147483648, %v3647_v20  ;;  %v3914_v44 = vadd.f32 %v3799_v8, %v1209_v28  ;;  %vm3928_vm0 = vmor %vm1136_vm14, %vm1137_vm15 }
 0x16e   : > { %2875 = vrcp.f32 %v3891_v9  ;;  %v1223_v60 = vsub.f32 1.0, %v1222_v12  ;;  %v2545_v40 = vmul.f32 -1.442695, %v3877_v46  ;;  %v1798_v47 = vmul.f32 %v3727_v53, %v3758_v37  ;;  %v3945_v15 = vpop.f32.mrf.mxu1 }
 0x16f   : > { %2877 = vpow2.f32 %v2542_v42  ;;  %v1134_v55 = vmul.f32 %v3735_v5, %v1133_v62  ;;  %v1177_v42 = vmul.f32 %v3901_v2, %v3809_v30  ;;  %vm3936_vm1 = vcmp.eq.f32.partialorder %v1140_v24, 8.507059e+37 }
 0x170   : > { %2879 = vrcp.f32 %v3903_v7  ;;  %vm1181_vm2 = vweird.f32 %v3809_v30  ;;  %vm1182_vm3 = vweird.f32 %v3901_v2  ;;  %v1187_v62 = vand.u32 2147483648, %v3809_v30 }
 0x171   : > { %v1135_v28 = vadd.f32 %v3735_v5, %v1134_v55  ;;  %v1178_v12 = vsub.f32 1.0, %v1177_v42  ;;  %vm1226_vm5 = vweird.f32 %v3786_v29  ;;  %vm3975_vm6 = vmor %vm1181_vm2, %vm1182_vm3  ;;  %v3979_v42 = vpop.f32.mrf.mxu0  ;;  %vm1196_vm8 = vweird.f32 %v3836_v63 }
 0x172   : > { %759 = vmatmul.bf16.gmra.mxu2 %v3319_v43  ;;  %v717_v37 = vpop.f32.mrf.mxu2  ;;  %vm1227_vm11 = vweird.f32 %v3866_v1  ;;  %vm1241_vm14 = vweird.f32 %v3891_v9 }
 0x173   : > { %828 = vmatmul.bf16.gmra.mxu3 %v3319_v43  ;;  %v3888_v32 = vpop.f32.mrf.mxu3  ;;  %v1124_v43 = vsel %vm3860_vm10, %v3724_v49, %v1120_v14  ;;  %v3909_v49 = vpop.eup %2871  ;;  %v2543_v14 = vmul.f32 -1.442695, %v3789_v36  ;;  %v1179_v55 = vmul.f32 %v3901_v2, %v1178_v12  ;;  %vm3992_vm10 = vcmp.eq.f32.partialorder %v1215_v0, 8.507059e+37 }
 0x174   : > { %v1129_v26 = vsel %vm1126_vm12, %v1128_v33, %v1124_v43  ;;  %v1185_v33 = vand.u32 2147483647, %v3809_v30  ;;  %v1192_v24 = vmul.f32 %v3909_v49, %v3836_v63  ;;  %vm1197_vm9 = vweird.f32 %v3909_v49 }
 0x175   : > { %v1752_v59 = vmul.f32 %v1129_v26, %v3397_v27  ;;  %v1143_v27 = vor.u32 1.1754944e-38, %v1142_v13  ;;  %2881 = vpow2.f32 %v2543_v14  ;;  %v1139_v26 = vsel %vm3928_vm0, %v3735_v5, %v1135_v28  ;;  %vm4010_vm12 = vmor %vm1196_vm8, %vm1197_vm9 }
 0x176   : > { %v1224_v14 = vmul.f32 %v3866_v1, %v1223_v60  ;;  %2883 = vpow2.f32 %v2545_v40  ;;  %v1188_v40 = vor.u32 1.1754944e-38, %v1187_v62  ;;  %v1180_v28 = vadd.f32 %v3901_v2, %v1179_v55  ;;  %vm4054_vm0 = vmor %vm1226_vm5, %vm1227_vm11 }
 0x177   : > { %v1800_v3 = vmul.f32 %v1752_v59, %v3827_v50  ;;  %v2874_v50 = vpop.eup %2873  ;;  %v1144_v5 = vsel %vm3936_vm1, %v1143_v27, %v1139_v26  ;;  %v1193_v27 = vsub.f32 1.0, %v1192_v24  ;;  %vm3982_vm7 = vcmp.eq.f32.partialorder %v1185_v33, 8.507059e+37 }
 0x178   : > { %v3953_v13 = vpop.eup %2875  ;;  %v1753_v18 = vmul.f32 %v1144_v5, %v3411_v35  ;;  %v1214_v33 = vsel %vm3959_vm4, %v3799_v8, %v3914_v44  ;;  %v1184_v34 = vsel %vm3975_vm6, %v3901_v2, %v1180_v28  ;;  %v1225_v5 = vadd.f32 %v3866_v1, %v1224_v14 }
 0x179   : > { %v1844_v43 = vpack.c.bf16 %v1800_v3, %v1798_v47  ;;  %v2878_v47 = vpop.eup %2877  ;;  %v3968_v3 = vadd.f32 1.0, %v2874_v50  ;;  %v1799_v50 = vmul.f32 %v3857_v4, %v3760_v41  ;;  %v1194_v12 = vmul.f32 %v3909_v49, %v1193_v27 }
 0x17a   : > { %v3988_v35 = vpop.eup %2879  ;;  %v4005_v26 = vadd.f32 1.0, %v2878_v47  ;;  %v1200_v41 = vand.u32 2147483647, %v3836_v63  ;;  %v2548_v4 = vmul.f32 -1.442695, %v3979_v42  ;;  %v1189_v24 = vsel %vm3982_vm7, %v1188_v40, %v1184_v34  ;;  %v4019_v44 = vpop.f32.mrf.mxu2 }
 0x17b   : > { %v3941_v20 = vpop.f32.mrf.mxu3  ;;  %2007 = vmatmul.bf16.gmra.mxu0 %v1844_v43  ;;  %v1801_v43 = vmul.f32 %v1753_v18, %v3829_v10  ;;  %v2882_v10 = vpop.eup %2881  ;;  %v1195_v8 = vadd.f32 %v3909_v49, %v1194_v12  ;;  %2885 = vrcp.f32 %v3968_v3  ;;  %v1756_v55 = vmul.f32 %v1189_v24, %v3463_v61 }
 0x17c   : > { %v2884_v2 = vpop.eup %2883  ;;  %v1202_v47 = vand.u32 2147483648, %v3836_v63  ;;  %v2546_v18 = vmul.f32 -1.442695, %v3905_v39  ;;  %vm1201_vm13 = vcmp.eq.f32.partialorder %v1200_v41, 8.507059e+37  ;;  %v1237_v40 = vmul.f32 %v3953_v13, %v3891_v9  ;;  %v4038_v63 = vpop.f32.mrf.mxu1 }
 0x17d   : > { %v1845_v62 = vpack.c.bf16 %v1801_v43, %v1799_v50  ;;  %v1199_v60 = vsel %vm4010_vm12, %v3909_v49, %v1195_v8  ;;  %2887 = vrcp.f32 %v4005_v26  ;;  %v4034_v14 = vadd.f32 1.0, %v2882_v10 }
 0x17e   : > { %v1804_v27 = vmul.f32 %v1756_v55, %v717_v37  ;;  %v1203_v28 = vor.u32 1.1754944e-38, %v1202_v47  ;;  %v4036_v61 = vadd.f32 1.0, %v2884_v2  ;;  %2889 = vpow2.f32 %v2548_v4 }
 0x17f   : > { %2076 = vmatmul.bf16.gmra.mxu1 %v1845_v62  ;;  %v1238_v53 = vsub.f32 1.0, %v1237_v40  ;;  %v1252_v50 = vmul.f32 %v3988_v35, %v3903_v7  ;;  %v1802_v49 = vmul.f32 %v3869_v48, %v3886_v11  ;;  %vm1242_vm15 = vweird.f32 %v3953_v13 }
 0x180   : > { %v1204_v43 = vsel %vm1201_vm13, %v1203_v28, %v1199_v60  ;;  %2891 = vpow2.f32 %v2546_v18  ;;  %v1247_v12 = vand.u32 2147483648, %v3891_v9  ;;  %v2549_v48 = vmul.f32 -1.442695, %v4038_v63  ;;  %vm4075_vm2 = vmor %vm1241_vm14, %vm1242_vm15 }
 0x181   : > { %v1239_v37 = vmul.f32 %v3953_v13, %v1238_v53  ;;  %v1253_v34 = vsub.f32 1.0, %v1252_v50  ;;  %v4048_v0 = vpop.eup %2885  ;;  %2893 = vrcp.f32 %v4034_v14  ;;  %v1846_v11 = vpack.c.bf16 %v1804_v27, %v1802_v49 }
 0x182   : > { %v1245_v10 = vand.u32 2147483647, %v3891_v9  ;;  %v1755_v4 = vmul.f32 %v3873_v22, %v3443_v21  ;;  %vm4065_vm1 = vcmp.eq.f32.partialorder %v1230_v45, 8.507059e+37  ;;  %v1757_v24 = vmul.f32 %v1204_v43, %v3504_v17  ;;  %v722_v8 = vpop.f32.mrf.mxu2 }
 0x183   : > { %v4021_v59 = vpop.f32.mrf.mxu3  ;;  %v1240_v2 = vadd.f32 %v3953_v13, %v1239_v37  ;;  %v4081_v22 = vpop.eup %2887  ;;  %v1219_v45 = vsel %vm3992_vm10, %v3881_v6, %v1214_v33  ;;  %v1233_v17 = vor.u32 1.1754944e-38, %v1232_v56  ;;  %2895 = vrcp.f32 %v4036_v61 }
 0x184   : > { %v2547_v47 = vmul.f32 -1.442695, %v3945_v15  ;;  %v2890_v9 = vpop.eup %2889  ;;  %v1229_v18 = vsel %vm4054_vm0, %v3866_v1, %v1225_v5  ;;  %v1805_v60 = vmul.f32 %v1757_v24, %v3941_v20  ;;  %v1248_v40 = vor.u32 1.1754944e-38, %v1247_v12 }
 0x185   : > { %v1254_v27 = vmul.f32 %v3988_v35, %v1253_v34  ;;  %2897 = vpow2.f32 %v2549_v48  ;;  %v1244_v29 = vsel %vm4075_vm2, %v3953_v13, %v1240_v2  ;;  %vm1246_vm3 = vcmp.eq.f32.partialorder %v1245_v10, 8.507059e+37 }
 0x186   : > { %v1297_v6 = vmul.f32 %v4048_v0, %v3968_v3  ;;  %v2892_v56 = vpop.eup %2891  ;;  %v1267_v30 = vmul.f32 %v4081_v22, %v4005_v26  ;;  %v1803_v1 = vmul.f32 %v1755_v4, %v3888_v32  ;;  %vm1256_vm4 = vweird.f32 %v3903_v7 }
 0x187   : > { %vm1257_vm5 = vweird.f32 %v3988_v35  ;;  %v4105_v20 = vpop.eup %2893  ;;  %v1234_v33 = vsel %vm4065_vm1, %v1233_v17, %v1229_v18  ;;  %2899 = vpow2.f32 %v2547_v47  ;;  %v4109_v13 = vadd.f32 1.0, %v2890_v9 }
 0x188   : > { %v1262_v5 = vand.u32 2147483648, %v3903_v7  ;;  %v1847_v28 = vpack.c.bf16 %v1805_v60, %v1803_v1  ;;  %v1249_v53 = vsel %vm1246_vm3, %v1248_v40, %v1244_v29  ;;  %v1255_v50 = vadd.f32 %v3988_v35, %v1254_v27  ;;  %vm4124_vm6 = vmor %vm1256_vm4, %vm1257_vm5 }
 0x189   : > { %v1260_v32 = vand.u32 2147483647, %v3903_v7  ;;  %v4114_v49 = vpop.eup %2895  ;;  %v1455_v43 = vand.u32 2147483647, %v3522_v52  ;;  %v4118_v37 = vadd.f32 1.0, %v3552_v25  ;;  %v4120_v12 = vadd.f32 1.0, %v2892_v56 }
 0x18a   : > { %v1298_v41 = vsub.f32 1.0, %v1297_v6  ;;  %v5142_v48 = vand.u32 2147483648, %v3522_v52  ;;  %2901 = vpow2.f32 %v3528_v51  ;;  %v1268_v10 = vsub.f32 1.0, %v1267_v30  ;;  %v4135_v4 = vpop.f32.mrf.mxu2 }
 0x18b   : > { %v4079_v21 = vpop.f32.mrf.mxu3  ;;  %2012 = vmatmul.bf16.gmra.mxu0 %v1846_v11  ;;  %v1282_v25 = vmul.f32 %v4105_v20, %v4034_v14  ;;  %v2898_v7 = vpop.eup %2897  ;;  %v1758_v24 = vmul.f32 %v1219_v45, %v3550_v23  ;;  %v1759_v2 = vmul.f32 %v1234_v33, %v3616_v19  ;;  %v1760_v55 = vmul.f32 %v1249_v53, %v3649_v38 }
 0x18c   : > { %v4130_v11 = vor.u32 1.1754944e-38, %v5142_v48  ;;  %v1263_v17 = vor.u32 1.1754944e-38, %v1262_v5  ;;  %2903 = vrcp.f32 %v4109_v13  ;;  %v1259_v51 = vsel %vm4124_vm6, %v3988_v35, %v1255_v50 }
 0x18d   : > { %vm1261_vm7 = vcmp.eq.f32.partialorder %v1260_v32, 8.507059e+37  ;;  %v1312_v47 = vmul.f32 %v4114_v49, %v4036_v61  ;;  %v2900_v9 = vpop.eup %2899  ;;  %vm1271_vm8 = vweird.f32 %v4005_v26  ;;  %2905 = vrcp.f32 %v4120_v12 }
 0x18e   : > { %v1808_v23 = vmul.f32 %v1760_v55, %v722_v8  ;;  %v1299_v19 = vmul.f32 %v4048_v0, %v1298_v41  ;;  %v1269_v38 = vmul.f32 %v4081_v22, %v1268_v10  ;;  %v1277_v45 = vand.u32 2147483648, %v4005_v26 }
 0x18f   : > { %2081 = vmatmul.bf16.gmra.mxu1 %v1847_v28  ;;  %v1283_v18 = vsub.f32 1.0, %v1282_v25  ;;  %v4153_v60 = vadd.f32 1.0, %v2898_v7  ;;  %v1806_v35 = vmul.f32 %v1758_v24, %v4019_v44  ;;  %v1264_v40 = vsel %vm1261_vm7, %v1263_v17, %v1259_v51 }
 0x190   : > { %vm1301_vm9 = vweird.f32 %v3968_v3  ;;  %vm1302_vm10 = vweird.f32 %v4048_v0  ;;  %v4158_v27 = vpop.eup %2901  ;;  %vm1272_vm11 = vweird.f32 %v4081_v22  ;;  %v1275_v8 = vand.u32 2147483647, %v4005_v26 }
 0x191   : > { %v1307_v29 = vand.u32 2147483648, %v3968_v3  ;;  %v1313_v6 = vsub.f32 1.0, %v1312_v47  ;;  %v4163_v56 = vadd.f32 1.0, %v2900_v9  ;;  %v1848_v30 = vpack.c.bf16 %v1808_v23, %v1806_v35  ;;  %vm4177_vm13 = vmor %vm1301_vm9, %vm1302_vm10 }
 0x192   : > { %v1300_v1 = vadd.f32 %v4048_v0, %v1299_v19  ;;  %v1305_v44 = vand.u32 2147483647, %v3968_v3  ;;  %v4167_v33 = vpop.eup %2903  ;;  %vm1286_vm12 = vweird.f32 %v4034_v14  ;;  %v1290_v5 = vand.u32 2147483647, %v4034_v14  ;;  %v727_v50 = vpop.f32.mrf.mxu2  ;;  %vm4192_vm14 = vmor %vm1271_vm8, %vm1272_vm11 }
 0x193   : > { %v4137_v62 = vpop.f32.mrf.mxu3  ;;  %v1292_v28 = vand.u32 2147483648, %v4034_v14  ;;  %v1761_v53 = vmul.f32 %v1264_v40, %v3703_v31  ;;  %v4183_v41 = vpop.eup %2905  ;;  %v1270_v48 = vadd.f32 %v4081_v22, %v1269_v38  ;;  %v1278_v10 = vor.u32 1.1754944e-38, %v1277_v45 }
 0x194   : > { %v1284_v25 = vmul.f32 %v4105_v20, %v1283_v18  ;;  %2907 = vrcp.f32 %v4153_v60  ;;  %vm1287_vm15 = vweird.f32 %v4105_v20  ;;  %v1308_v7 = vor.u32 1.1754944e-38, %v1307_v29 }
 0x195   : > { %v1809_v3 = vmul.f32 %v1761_v53, %v4079_v21  ;;  %v1314_v24 = vmul.f32 %v4114_v49, %v1313_v6  ;;  %2909 = vrcp.f32 %v4163_v56  ;;  %v1304_v55 = vsel %vm4177_vm13, %v4048_v0, %v1300_v1  ;;  %vm4219_vm4 = vmor %vm1286_vm12, %vm1287_vm15  ;;  %v5151_v53 = vld [vmem:[#allocation37_spill] sm:$0xff] }
 0x196   : > { %vm1306_vm0 = vcmp.eq.f32.partialorder %v1305_v44, 8.507059e+37  ;;  %v1357_v26 = vmul.f32 %v4167_v33, %v4109_v13  ;;  %v1327_v17 = vmul.f32 %v4183_v41, %v4120_v12  ;;  %v1807_v51 = vmul.f32 %v1759_v2, %v4021_v59 }
 0x197   : > { %vm1316_vm1 = vweird.f32 %v4036_v61  ;;  %vm1317_vm2 = vweird.f32 %v4114_v49  ;;  %v1274_v21 = vsel %vm4192_vm14, %v4081_v22, %v1270_v48  ;;  %vm1276_vm3 = vcmp.eq.f32.partialorder %v1275_v8, 8.507059e+37 }
 0x198   : > { %v1285_v0 = vadd.f32 %v4105_v20, %v1284_v25  ;;  %v1322_v47 = vand.u32 2147483648, %v4036_v61  ;;  %v1849_v59 = vpack.c.bf16 %v1809_v3, %v1807_v51  ;;  %v1309_v2 = vsel %vm1306_vm0, %v1308_v7, %v1304_v55  ;;  %vm4234_vm5 = vmor %vm1316_vm1, %vm1317_vm2 }
 0x199   : > { %v1315_v23 = vadd.f32 %v4114_v49, %v1314_v24  ;;  %v1320_v19 = vand.u32 2147483647, %v4036_v61  ;;  %2911 = vrcp.f32 %v4118_v37  ;;  %v1470_v38 = vand.u32 2147483647, %v4118_v37 }
 0x19a   : > { %v4225_v22 = vpop.eup %2907  ;;  %v4230_v45 = vadd.f32 1.0, %v3576_v54  ;;  %v1358_v18 = vsub.f32 1.0, %v1357_v26  ;;  %v2558_v35 = vmul.f32 -1.442695, %v3348_v58  ;;  %v1279_v40 = vsel %vm1276_vm3, %v1278_v10, %v1274_v21  ;;  %v4239_v6 = vpop.f32.mrf.mxu2  ;;  %v5152_v10 = vld [vmem:[#allocation16_spill] sm:$0xff] }
 0x19b   : > { %v4181_v34 = vpop.f32.mrf.mxu3  ;;  %2017 = vmatmul.bf16.gmra.mxu0 %v1848_v30  ;;  %v1293_v8 = vor.u32 1.1754944e-38, %v1292_v28  ;;  %v1328_v29 = vsub.f32 1.0, %v1327_v17  ;;  %v4243_v1 = vpop.eup %2909  ;;  %v1289_v54 = vsel %vm4219_vm4, %v4105_v20, %v1285_v0  ;;  %vm1291_vm6 = vcmp.eq.f32.partialorder %v1290_v5, 8.507059e+37 }
 0x19c   : > { %v1764_v61 = vmul.f32 %v1309_v2, %v3834_v16  ;;  %v1323_v44 = vor.u32 1.1754944e-38, %v1322_v47  ;;  %v4251_v32 = vmul.f32 %v5151_v53, %v3522_v52  ;;  %v1319_v28 = vsel %vm4234_vm5, %v4114_v49, %v1315_v23 }
 0x19d   : > { %vm1321_vm7 = vcmp.eq.f32.partialorder %v1320_v19, 8.507059e+37  ;;  %v1372_v48 = vmul.f32 %v4225_v22, %v4153_v60  ;;  %v2559_v25 = vmul.f32 -1.442695, %v5152_v10  ;;  %v1762_v20 = vmul.f32 %v1279_v40, %v3740_v57  ;;  %v5155_v19 = vld [vmem:[#allocation17_spill] sm:$0xff] }
 0x19e   : > { %v1812_v5 = vmul.f32 %v1764_v61, %v727_v50  ;;  %v1359_v16 = vmul.f32 %v4167_v33, %v1358_v18  ;;  %2913 = vpow2.f32 %v2558_v35  ;;  %v1294_v31 = vsel %vm1291_vm6, %v1293_v8, %v1289_v54 }
 0x19f   : > { %2086 = vmatmul.bf16.gmra.mxu1 %v1849_v59  ;;  %v1329_v3 = vmul.f32 %v4183_v41, %v1328_v29  ;;  %v1342_v7 = vmul.f32 %v4243_v1, %v4163_v56  ;;  %v4264_v24 = vpop.eup %2911  ;;  %v1810_v49 = vmul.f32 %v1762_v20, %v4135_v4  ;;  %v1324_v55 = vsel %vm1321_vm7, %v1323_v44, %v1319_v28  ;;  %v5158_v44 = vld [vmem:[#allocation29_spill] sm:$0xff] }
 0x1a0   : > { %vm1361_vm8 = vweird.f32 %v4109_v13  ;;  %vm1362_vm9 = vweird.f32 %v4167_v33  ;;  %vm1331_vm10 = vweird.f32 %v4120_v12  ;;  %v1337_v57 = vand.u32 2147483648, %v4120_v12 }
 0x1a1   : > { %v1367_v50 = vand.u32 2147483648, %v4109_v13  ;;  %v1373_v26 = vsub.f32 1.0, %v1372_v48  ;;  %vm1332_vm11 = vweird.f32 %v4183_v41  ;;  %v1850_v17 = vpack.c.bf16 %v1812_v5, %v1810_v49  ;;  %vm4281_vm12 = vmor %vm1361_vm8, %vm1362_vm9 }
 0x1a2   : > { %v1360_v51 = vadd.f32 %v4167_v33, %v1359_v16  ;;  %v1365_v21 = vand.u32 2147483647, %v4109_v13  ;;  %v1448_v4 = vsub.f32 1.0, %v4251_v32  ;;  %v1462_v0 = vmul.f32 %v4264_v24, %v4118_v37  ;;  %v732_v59 = vpop.f32.mrf.mxu2  ;;  %vm4295_vm13 = vmor %vm1331_vm10, %vm1332_vm11 }
 0x1a3   : > { %v4241_v30 = vpop.f32.mrf.mxu3  ;;  %v1343_v47 = vsub.f32 1.0, %v1342_v7  ;;  %v1765_v9 = vmul.f32 %v1324_v55, %v3877_v46  ;;  %v2560_v14 = vmul.f32 -1.442695, %v5155_v19  ;;  %v1763_v18 = vmul.f32 %v1294_v31, %v3789_v36  ;;  %v5166_v46 = vld [vmem:[#allocation18_spill] sm:$0xff] }
 0x1a4   : > { %v1330_v35 = vadd.f32 %v4183_v41, %v1329_v3  ;;  %v1335_v40 = vand.u32 2147483647, %v4120_v12  ;;  %v2914_v8 = vpop.eup %2913  ;;  %vm1346_vm14 = vweird.f32 %v4163_v56  ;;  %v1368_v29 = vor.u32 1.1754944e-38, %v1367_v50  ;;  %v5159_v12 = vld [vmem:[#allocation33_spill] sm:$0xff] }
 0x1a5   : > { %v1813_v13 = vmul.f32 %v1765_v9, %v4181_v34  ;;  %v1374_v36 = vmul.f32 %v4225_v22, %v1373_v26  ;;  %v1338_v54 = vor.u32 1.1754944e-38, %v1337_v57  ;;  %v1364_v61 = vsel %vm4281_vm12, %v4167_v33, %v1360_v51 }
 0x1a6   : > { %vm1366_vm15 = vcmp.eq.f32.partialorder %v1365_v21, 8.507059e+37  ;;  %v1417_v32 = vmul.f32 %v5159_v12, %v5158_v44  ;;  %v1344_v28 = vmul.f32 %v4243_v1, %v1343_v47  ;;  %v1811_v48 = vmul.f32 %v1763_v18, %v4137_v62  ;;  %v5165_v47 = vld [vmem:[#allocation34_spill] sm:$0xff] }
 0x1a7   : > { %vm1376_vm0 = vweird.f32 %v4153_v60  ;;  %vm1377_vm1 = vweird.f32 %v4225_v22  ;;  %v1334_v34 = vsel %vm4295_vm13, %v4183_v41, %v1330_v35  ;;  %vm1336_vm2 = vcmp.eq.f32.partialorder %v1335_v40, 8.507059e+37 }
 0x1a8   : > { %vm1347_vm3 = vweird.f32 %v4243_v1  ;;  %v1382_v33 = vand.u32 2147483648, %v4153_v60  ;;  %v1851_v20 = vpack.c.bf16 %v1813_v13, %v1811_v48  ;;  %v1369_v5 = vsel %vm1366_vm15, %v1368_v29, %v1364_v61  ;;  %vm4319_vm4 = vmor %vm1376_vm0, %vm1377_vm1 }
 0x1a9   : > { %v1375_v16 = vadd.f32 %v4225_v22, %v1374_v36  ;;  %v1380_v31 = vand.u32 2147483647, %v4153_v60  ;;  %v1463_v62 = vsub.f32 1.0, %v1462_v0  ;;  %2915 = vpow2.f32 %v2559_v25  ;;  %vm4338_vm6 = vmor %vm1346_vm14, %vm1347_vm3  ;;  %v5164_v0 = vld [vmem:[#allocation32_spill] sm:$0xff] }
 0x1aa   : > { %v1352_v3 = vand.u32 2147483648, %v4163_v56  ;;  %v1418_v41 = vsub.f32 1.0, %v1417_v32  ;;  %vm1451_vm5 = vweird.f32 %v3522_v52  ;;  %v4324_v49 = vadd.f32 1.0, %v2914_v8  ;;  %v4328_v26 = vpop.f32.mrf.mxu2 }
 0x1ab   : > { %v4285_v23 = vpop.f32.mrf.mxu3  ;;  %2022 = vmatmul.bf16.gmra.mxu0 %v1850_v17  ;;  %v1339_v55 = vsel %vm1336_vm2, %v1338_v54, %v1334_v34  ;;  %v1345_v57 = vadd.f32 %v4243_v1, %v1344_v28  ;;  %v1350_v50 = vand.u32 2147483647, %v4163_v56  ;;  %v1449_v25 = vmul.f32 %v5151_v53, %v1448_v4 }
 0x1ac   : > { %2917 = vrcp.f32 %v4230_v45  ;;  %v1768_v51 = vmul.f32 %v1369_v5, %v3979_v42  ;;  %v1383_v21 = vor.u32 1.1754944e-38, %v1382_v33  ;;  %vm1466_vm7 = vweird.f32 %v4118_v37  ;;  %v5171_v5 = vld [vmem:[#allocation19_spill] sm:$0xff] }
 0x1ad   : > { %2919 = vpow2.f32 %v2560_v14  ;;  %v1379_v4 = vsel %vm4319_vm4, %v4225_v22, %v1375_v16  ;;  %vm1381_vm8 = vcmp.eq.f32.partialorder %v1380_v31, 8.507059e+37  ;;  %v1432_v9 = vmul.f32 %v5165_v47, %v5164_v0 }
 0x1ae   : > { %v1766_v56 = vmul.f32 %v1339_v55, %v3905_v39  ;;  %v1353_v2 = vor.u32 1.1754944e-38, %v1352_v3  ;;  %v1816_v18 = vmul.f32 %v1768_v51, %v732_v59  ;;  %v1419_v35 = vmul.f32 %v5159_v12, %v1418_v41 }
 0x1af   : > { %2091 = vmatmul.bf16.gmra.mxu1 %v1851_v20  ;;  %v1464_v42 = vmul.f32 %v4264_v24, %v1463_v62  ;;  %2921 = vrcp.f32 %v4324_v49  ;;  %v1349_v14 = vsel %vm4338_vm6, %v4243_v1, %v1345_v57  ;;  %vm1351_vm9 = vcmp.eq.f32.partialorder %v1350_v50, 8.507059e+37  ;;  %v2916_v22 = vpop.eup %2915 }
 0x1b0   : > { %vm1452_vm10 = vweird.f32 %v5151_v53  ;;  %v4358_v40 = vadd.f32 1.0, %v4158_v27  ;;  %v1814_v39 = vmul.f32 %v1766_v56, %v4239_v6  ;;  %v1384_v59 = vsel %vm1381_vm8, %v1383_v21, %v1379_v4 }
 0x1b1   : > { %v1450_v8 = vadd.f32 %v5151_v53, %v1449_v25  ;;  %vm1467_vm11 = vweird.f32 %v4264_v24  ;;  %v2561_v13 = vmul.f32 -1.442695, %v5166_v46  ;;  %v1433_v29 = vsub.f32 1.0, %v1432_v9  ;;  %vm4385_vm14 = vmor %vm1451_vm5, %vm1452_vm10  ;;  %v5176_v9 = vld [vmem:[#allocation20_spill] sm:$0xff] }
 0x1b2   : > { %v4364_v36 = vpop.eup %2917  ;;  %v1354_v1 = vsel %vm1351_vm9, %v1353_v2, %v1349_v14  ;;  %v1852_v54 = vpack.c.bf16 %v1816_v18, %v1814_v39  ;;  %v1420_v61 = vadd.f32 %v5159_v12, %v1419_v35  ;;  %vm1422_vm12 = vweird.f32 %v5159_v12  ;;  %v737_v34 = vpop.f32.mrf.mxu2  ;;  %vm4412_vm1 = vmor %vm1466_vm7, %vm1467_vm11  ;;  %v5177_v18 = vld [vmem:[#allocation21_spill] sm:$0xff] }
 0x1b3   : > { %v4330_v60 = vpop.f32.mrf.mxu3  ;;  %v2920_v27 = vpop.eup %2919  ;;  %vm4370_vm13 = vcmp.eq.f32.partialorder %v1455_v43, 8.507059e+37  ;;  %v1465_v32 = vadd.f32 %v4264_v24, %v1464_v42  ;;  %v4375_v28 = vadd.f32 1.0, %v2916_v22  ;;  %v1769_v48 = vmul.f32 %v1384_v59, %v4038_v63  ;;  %v5178_v59 = vld [vmem:[#allocation9_spill] sm:$0xff]  ;;  %v5183_v43 = vld [vmem:[#allocation12_spill] sm:$0xff] }
 0x1b4   : > { %v1427_v33 = vand.u32 2147483648, %v5158_v44  ;;  %2923 = vrcp.f32 %v4358_v40  ;;  %v2562_v16 = vmul.f32 -1.442695, %v5171_v5  ;;  %vm1421_vm15 = vweird.f32 %v5158_v44 }
 0x1b5   : > { %v1425_v63 = vand.u32 2147483647, %v5158_v44  ;;  %v4393_v31 = vpop.eup %2921  ;;  %v1472_v62 = vand.u32 2147483648, %v4118_v37  ;;  %v1767_v3 = vmul.f32 %v1354_v1, %v3945_v15  ;;  %v1817_v52 = vmul.f32 %v1769_v48, %v4285_v23  ;;  %vm4400_vm0 = vmor %vm1421_vm15, %vm1422_vm12 }
 0x1b6   : > { %v1434_v41 = vmul.f32 %v5165_v47, %v1433_v29  ;;  %v1454_v44 = vsel %vm4385_vm14, %v5151_v53, %v1450_v8  ;;  %2925 = vpow2.f32 %v2561_v13  ;;  %v1424_v23 = vsel %vm4400_vm0, %v5159_v12, %v1420_v61  ;;  %v5179_v8 = vld [vmem:[#allocation36_spill] sm:$0xff] }
 0x1b7   : > { %v1477_v55 = vmul.f32 %v4364_v36, %v4230_v45  ;;  %v1469_v53 = vsel %vm4412_vm1, %v4264_v24, %v1465_v32  ;;  %2927 = vrcp.f32 %v4375_v28  ;;  %v1815_v57 = vmul.f32 %v1767_v3, %v4241_v30  ;;  %v5184_v3 = vld [vmem:[#allocation35_spill] sm:$0xff] }
 0x1b8   : > { %v1428_v50 = vor.u32 1.1754944e-38, %v1427_v33  ;;  %v1507_v25 = vmul.f32 %v4393_v31, %v4324_v49  ;;  %v4428_v17 = vadd.f32 1.0, %v2920_v27  ;;  %2929 = vpow2.f32 %v2562_v16 }
 0x1b9   : > { %vm1426_vm2 = vcmp.eq.f32.partialorder %v1425_v63, 8.507059e+37  ;;  %v1853_v12 = vpack.c.bf16 %v1817_v52, %v1815_v57  ;;  %v1435_v21 = vadd.f32 %v5165_v47, %v1434_v41  ;;  %vm1437_vm3 = vweird.f32 %v5165_v47 }
 0x1ba   : > { %v1429_v51 = vsel %vm1426_vm2, %v1428_v50, %v1424_v23  ;;  %v4432_v4 = vpop.eup %2923  ;;  %v1473_v24 = vor.u32 1.1754944e-38, %v1472_v62  ;;  %v2563_v56 = vmul.f32 -1.442695, %v5176_v9  ;;  %v1442_v30 = vand.u32 2147483648, %v5164_v0  ;;  %v4441_v14 = vpop.f32.mrf.mxu2 }
 0x1bb   : > { %v4379_v20 = vpop.f32.mrf.mxu3  ;;  %2027 = vmatmul.bf16.gmra.mxu0 %v1852_v54  ;;  %v1478_v2 = vsub.f32 1.0, %v1477_v55  ;;  %vm1471_vm4 = vcmp.eq.f32.partialorder %v1470_v38, 8.507059e+37  ;;  %v2564_v35 = vmul.f32 -1.442695, %v5177_v18  ;;  %vm1436_vm5 = vweird.f32 %v5164_v0  ;;  %v5180_v38 = vld [vmem:[#allocation10_spill] sm:$0xff] }
 0x1bc   : > { %v1440_v42 = vand.u32 2147483647, %v5164_v0  ;;  %v2926_v39 = vpop.eup %2925  ;;  %v1771_v13 = vmul.f32 %v5179_v8, %v5178_v59  ;;  %v1459_v29 = vsel %vm4370_vm13, %v4130_v11, %v1454_v44  ;;  %v1474_v37 = vsel %vm1471_vm4, %v1473_v24, %v1469_v53  ;;  %vm4453_vm6 = vmor %vm1436_vm5, %vm1437_vm3 }
 0x1bd   : > { %v1772_v1 = vmul.f32 %v1429_v51, %v5180_v38  ;;  %v4457_v0 = vpop.eup %2927  ;;  %v1508_v61 = vsub.f32 1.0, %v1507_v25  ;;  %2931 = vrcp.f32 %v4428_v17  ;;  %v1439_v27 = vsel %vm4453_vm6, %v5165_v47, %v1435_v21  ;;  %v5186_v25 = vld [vmem:[#allocation22_spill] sm:$0xff]  ;;  %v5187_v51 = vld [vmem:[#allocation11_spill] sm:$0xff] }
 0x1be   : > { %v1492_v11 = vmul.f32 %v4432_v4, %v4358_v40  ;;  %v2930_v6 = vpop.eup %2929  ;;  %2933 = vpow2.f32 %v2563_v56  ;;  %v1443_v48 = vor.u32 1.1754944e-38, %v1442_v30  ;;  %v1479_v33 = vmul.f32 %v4364_v36, %v1478_v2 }
 0x1bf   : > { %2096 = vmatmul.bf16.gmra.mxu1 %v1853_v12  ;;  %v1820_v32 = vmul.f32 %v1772_v1, %v737_v34  ;;  %v4467_v16 = vmul.f32 %v1459_v29, %v5183_v43  ;;  %v1517_v63 = vand.u32 2147483648, %v4324_v49  ;;  %2935 = vpow2.f32 %v2564_v35  ;;  %v5185_v34 = vld [vmem:[#allocation13_spill] sm:$0xff] }
 0x1c0   : > { %vm1441_vm7 = vcmp.eq.f32.partialorder %v1440_v42, 8.507059e+37  ;;  %v1522_v62 = vmul.f32 %v4457_v0, %v4375_v28  ;;  %v4472_v47 = vadd.f32 1.0, %v2926_v39  ;;  %v1818_v52 = vmul.f32 %v5184_v3, %v4328_v26 }
 0x1c1   : > { %v1444_v7 = vsel %vm1441_vm7, %v1443_v48, %v1439_v27  ;;  %v4477_v41 = vmul.f32 %v1474_v37, %v5185_v34  ;;  %v1509_v44 = vmul.f32 %v4393_v31, %v1508_v61  ;;  %v1515_v15 = vand.u32 2147483647, %v4324_v49  ;;  %v5196_v34 = vld [vmem:[#allocation25_spill] sm:$0xff] }
 0x1c2   : > { %v1493_v23 = vsub.f32 1.0, %v1492_v11  ;;  %vm1511_vm8 = vweird.f32 %v4324_v49  ;;  %v4482_v55 = vadd.f32 1.0, %v2930_v6  ;;  %v1854_v53 = vpack.c.bf16 %v1820_v32, %v1818_v52  ;;  %v742_v24 = vpop.f32.mrf.mxu2 }
 0x1c3   : > { %v4443_v22 = vpop.f32.mrf.mxu3  ;;  %v1480_v57 = vadd.f32 %v4364_v36, %v1479_v33  ;;  %vm1482_vm9 = vweird.f32 %v4364_v36  ;;  %v4486_v50 = vpop.eup %2931  ;;  %v4488_v26 = vor.u32 1.1754944e-38, %v1517_v63  ;;  %v2565_v12 = vmul.f32 -1.442695, %v5186_v25  ;;  %v5193_v63 = vld [vmem:[#allocation24_spill] sm:$0xff] }
 0x1c4   : > { %v1773_v21 = vmul.f32 %v1444_v7, %v5187_v51  ;;  %v1487_v56 = vand.u32 2147483648, %v4230_v45  ;;  %v2934_v2 = vpop.eup %2933  ;;  %v1523_v35 = vsub.f32 1.0, %v1522_v62  ;;  %2937 = vrcp.f32 %v4472_v47 }
 0x1c5   : > { %vm1481_vm10 = vweird.f32 %v4230_v45  ;;  %v1485_v42 = vand.u32 2147483647, %v4230_v45  ;;  %v2936_v39 = vpop.eup %2935  ;;  %vm1512_vm11 = vweird.f32 %v4393_v31  ;;  %v1530_v59 = vand.u32 2147483647, %v4375_v28 }
 0x1c6   : > { %v1821_v8 = vmul.f32 %v1773_v21, %v4379_v20  ;;  %vm4503_vm12 = vmor %vm1481_vm10, %vm1482_vm9  ;;  %v1494_v37 = vmul.f32 %v4432_v4, %v1493_v23  ;;  %v1510_v38 = vadd.f32 %v4393_v31, %v1509_v44  ;;  %2939 = vrcp.f32 %v4482_v55 }
 0x1c7   : > { %v1484_v45 = vsel %vm4503_vm12, %v4364_v36, %v1480_v57  ;;  %v1537_v20 = vmul.f32 %v4486_v50, %v4428_v17  ;;  %v4515_v1 = vadd.f32 1.0, %v2934_v2  ;;  %2941 = vpow2.f32 %v2565_v12  ;;  %v5192_v36 = vld [vmem:[#allocation23_spill] sm:$0xff]  ;;  %vm4538_vm1 = vmor %vm1511_vm8, %vm1512_vm11  ;;  %v5197_v57 = vld [vmem:[#allocation14_spill] sm:$0xff] }
 0x1c8   : > { %v1819_v54 = vmul.f32 %v1771_v13, %v4330_v60  ;;  %v1488_v61 = vor.u32 1.1754944e-38, %v1487_v56  ;;  %vm4518_vm13 = vcmp.eq.f32.partialorder %v1515_v15, 8.507059e+37  ;;  %v1524_v11 = vmul.f32 %v4457_v0, %v1523_v35 }
 0x1c9   : > { %vm1526_vm14 = vweird.f32 %v4375_v28  ;;  %v4524_v6 = vadd.f32 1.0, %v2936_v39  ;;  %v2566_v32 = vmul.f32 -1.442695, %v5192_v36  ;;  %vm1486_vm15 = vcmp.eq.f32.partialorder %v1485_v42, 8.507059e+37 }
 0x1ca   : > { %v1855_v48 = vpack.c.bf16 %v1821_v8, %v1819_v54  ;;  %v1489_v33 = vsel %vm1486_vm15, %v1488_v61, %v1484_v45  ;;  %v1495_v43 = vadd.f32 %v4432_v4, %v1494_v37  ;;  %vm1497_vm0 = vweird.f32 %v4432_v4  ;;  %v4529_v60 = vpop.eup %2937  ;;  %v4546_v23 = vpop.f32.mrf.mxu2 }
 0x1cb   : > { %v4493_v30 = vpop.f32.mrf.mxu3  ;;  %2032 = vmatmul.bf16.gmra.mxu0 %v1854_v53  ;;  %v1532_v13 = vand.u32 2147483648, %v4375_v28  ;;  %v2567_v62 = vmul.f32 -1.442695, %v5193_v63  ;;  %v1502_v3 = vand.u32 2147483648, %v4358_v40  ;;  %v1538_v52 = vsub.f32 1.0, %v1537_v20  ;;  %v5209_v20 = vld [vmem:[#allocation30_spill] sm:$0xff] }
 0x1cc   : > { %2943 = vrcp.f32 %v4515_v1  ;;  %v2568_v44 = vmul.f32 -1.442695, %v5196_v34  ;;  %vm1496_vm2 = vweird.f32 %v4358_v40  ;;  %v1500_v15 = vand.u32 2147483647, %v4358_v40  ;;  %v4548_v53 = vpop.eup %2939 }
 0x1cd   : > { %v1514_v49 = vsel %vm4538_vm1, %v4393_v31, %v1510_v38  ;;  %vm1527_vm3 = vweird.f32 %v4457_v0  ;;  %2945 = vpow2.f32 %v2566_v32  ;;  %v1776_v12 = vmul.f32 %v1489_v33, %v5197_v57  ;;  %vm4557_vm4 = vmor %vm1496_vm2, %vm1497_vm0  ;;  %v2942_v21 = vpop.eup %2941 }
 0x1ce   : > { %v1525_v56 = vadd.f32 %v4457_v0, %v1524_v11  ;;  %2947 = vrcp.f32 %v4524_v6  ;;  %v1499_v31 = vsel %vm4557_vm4, %v4432_v4, %v1495_v43  ;;  %v1552_v2 = vmul.f32 %v4529_v60, %v4472_v47  ;;  %vm4590_vm7 = vmor %vm1526_vm14, %vm1527_vm3  ;;  %v5205_v43 = vld [vmem:[#allocation15_spill] sm:$0xff] }
 0x1cf   : > { %2101 = vmatmul.bf16.gmra.mxu1 %v1855_v48  ;;  %2949 = vpow2.f32 %v2567_v62  ;;  %v1824_v35 = vmul.f32 %v1776_v12, %v742_v24  ;;  %v1503_v42 = vor.u32 1.1754944e-38, %v1502_v3  ;;  %v1539_v39 = vmul.f32 %v4486_v50, %v1538_v52  ;;  %v5204_v48 = vld [vmem:[#allocation26_spill] sm:$0xff] }
 0x1d0   : > { %vm4571_vm5 = vcmp.eq.f32.partialorder %v1530_v59, 8.507059e+37  ;;  %v1567_v29 = vmul.f32 %v4548_v53, %v4482_v55  ;;  %2951 = vpow2.f32 %v2568_v44  ;;  %vm1501_vm6 = vcmp.eq.f32.partialorder %v1500_v15, 8.507059e+37 }
 0x1d1   : > { %v1533_v37 = vor.u32 1.1754944e-38, %v1532_v13  ;;  %v4577_v38 = vadd.f32 1.0, %v2942_v21  ;;  %v1822_v4 = vmul.f32 %v4467_v16, %v4441_v14  ;;  %v1504_v45 = vsel %vm1501_vm6, %v1503_v42, %v1499_v31 }
 0x1d2   : > { %v4581_v24 = vpop.eup %2943  ;;  %v1519_v59 = vsel %vm4518_vm13, %v4488_v26, %v1514_v49  ;;  %v1575_v54 = vand.u32 2147483647, %v4482_v55  ;;  %v1577_v61 = vand.u32 2147483648, %v4482_v55  ;;  %v1553_v14 = vsub.f32 1.0, %v1552_v2  ;;  %v747_v62 = vpop.f32.mrf.mxu2 }
 0x1d3   : > { %v4561_v40 = vpop.f32.mrf.mxu3  ;;  %v2946_v16 = vpop.eup %2945  ;;  %v1529_v11 = vsel %vm4590_vm7, %v4457_v0, %v1525_v56  ;;  %v1856_v27 = vpack.c.bf16 %v1824_v35, %v1822_v4  ;;  %v1540_v26 = vadd.f32 %v4486_v50, %v1539_v39  ;;  %vm1542_vm8 = vweird.f32 %v4486_v50 }
 0x1d4   : > { %v4601_v28 = vpop.eup %2947  ;;  %v1568_v32 = vsub.f32 1.0, %v1567_v29  ;;  %v2569_v33 = vmul.f32 -1.442695, %v5204_v48  ;;  %v1777_v13 = vmul.f32 %v1504_v45, %v5205_v43  ;;  %v1547_v3 = vand.u32 2147483648, %v4428_v17  ;;  %v5208_v45 = vld [vmem:[#allocation27_spill] sm:$0xff] }
 0x1d5   : > { %v2950_v52 = vpop.eup %2949  ;;  %v1582_v7 = vmul.f32 %v4581_v24, %v4515_v1  ;;  %2953 = vrcp.f32 %v4577_v38  ;;  %vm1541_vm9 = vweird.f32 %v4428_v17  ;;  %v1545_v0 = vand.u32 2147483647, %v4428_v17 }
 0x1d6   : > { %v2952_v44 = vpop.eup %2951  ;;  %v1778_v15 = vmul.f32 %v1519_v59, %v3348_v58  ;;  %v4612_v49 = vor.u32 1.1754944e-38, %v1577_v61  ;;  %v1825_v57 = vmul.f32 %v1777_v13, %v4493_v30  ;;  %vm4617_vm10 = vmor %vm1541_vm9, %vm1542_vm8  ;;  %v1554_v51 = vmul.f32 %v4529_v60, %v1553_v14 }
 0x1d7   : > { %v1534_v21 = vsel %vm4571_vm5, %v1533_v37, %v1529_v11  ;;  %v4624_v56 = vadd.f32 1.0, %v2946_v16  ;;  %v1544_v58 = vsel %vm4617_vm10, %v4486_v50, %v1540_v26  ;;  %v1597_v30 = vmul.f32 %v4601_v28, %v4524_v6 }
 0x1d8   : > { %v1569_v31 = vmul.f32 %v4548_v53, %v1568_v32  ;;  %vm1571_vm11 = vweird.f32 %v4482_v55  ;;  %2955 = vpow2.f32 %v2569_v33  ;;  %v1823_v2 = vmul.f32 %v4477_v41, %v4443_v22 }
 0x1d9   : > { %v1548_v35 = vor.u32 1.1754944e-38, %v1547_v3  ;;  %v1583_v42 = vsub.f32 1.0, %v1582_v7  ;;  %v4637_v39 = vadd.f32 1.0, %v2950_v52  ;;  %v4639_v8 = vadd.f32 1.0, %v2952_v44 }
 0x1da   : > { %vm1546_vm12 = vcmp.eq.f32.partialorder %v1545_v0, 8.507059e+37  ;;  %v1857_v50 = vpack.c.bf16 %v1825_v57, %v1823_v2  ;;  %v1555_v37 = vadd.f32 %v4529_v60, %v1554_v51  ;;  %vm1557_vm13 = vweird.f32 %v4529_v60  ;;  %v4652_v16 = vpop.f32.mrf.mxu2 }
 0x1db   : > { %2037 = vmatmul.bf16.gmra.mxu0 %v1856_v27  ;;  %v4629_v17 = vpop.f32.mrf.mxu3  ;;  %v1549_v29 = vsel %vm1546_vm12, %v1548_v35, %v1544_v58  ;;  %v4643_v4 = vpop.eup %2953  ;;  %2957 = vrcp.f32 %v4624_v56  ;;  %v2570_v59 = vmul.f32 -1.442695, %v5208_v45  ;;  %v1562_v22 = vand.u32 2147483648, %v4472_v47 }
 0x1dc   : > { %v1598_v41 = vsub.f32 1.0, %v1597_v30  ;;  %vm1586_vm14 = vweird.f32 %v4515_v1  ;;  %v2572_v61 = vmul.f32 -1.442695, %v5209_v20  ;;  %vm1556_vm15 = vweird.f32 %v4472_v47  ;;  %v5216_v30 = vld [vmem:[#allocation28_spill] sm:$0xff] }
 0x1dd   : > { %v1560_v14 = vand.u32 2147483647, %v4472_v47  ;;  %v1570_v11 = vadd.f32 %v4548_v53, %v1569_v31  ;;  %vm1572_vm0 = vweird.f32 %v4548_v53  ;;  %vm4656_vm1 = vcmp.eq.f32.partialorder %v1575_v54, 8.507059e+37  ;;  %vm4664_vm2 = vmor %vm1556_vm15, %vm1557_vm13 }
 0x1de   : > { %2959 = vrcp.f32 %v4637_v39  ;;  %v1780_v26 = vmul.f32 %v1549_v29, %v5155_v19  ;;  %v2956_v47 = vpop.eup %2955  ;;  %v1584_v33 = vmul.f32 %v4581_v24, %v1583_v42  ;;  %v1559_v54 = vsel %vm4664_vm2, %v4529_v60, %v1555_v37  ;;  %vm4684_vm4 = vmor %vm1571_vm11, %vm1572_vm0  ;;  %v5217_v42 = vld [vmem:[#allocation31_spill] sm:$0xff] }
 0x1df   : > { %2961 = vrcp.f32 %v4639_v8  ;;  %2106 = vmatmul.bf16.gmra.mxu1 %v1857_v50  ;;  %v1612_v43 = vmul.f32 %v4643_v4, %v4577_v38  ;;  %v1563_v13 = vor.u32 1.1754944e-38, %v1562_v22  ;;  %v1599_v3 = vmul.f32 %v4601_v28, %v1598_v41 }
 0x1e0   : > { %2963 = vpow2.f32 %v2570_v59  ;;  %v1828_v19 = vmul.f32 %v1780_v26, %v747_v62  ;;  %v1779_v52 = vmul.f32 %v1534_v21, %v5152_v10  ;;  %v1590_v7 = vand.u32 2147483647, %v4515_v1 }
 0x1e1   : > { %2965 = vpow2.f32 %v2572_v61  ;;  %vm1561_vm3 = vcmp.eq.f32.partialorder %v1560_v14, 8.507059e+37  ;;  %v4678_v0 = vpop.eup %2957  ;;  %v1592_v62 = vand.u32 2147483648, %v4515_v1  ;;  %v4689_v44 = vadd.f32 1.0, %v2956_v47 }
 0x1e2   : > { %v1826_v10 = vmul.f32 %v1778_v15, %v4546_v23  ;;  %v1564_v57 = vsel %vm1561_vm3, %v1563_v13, %v1559_v54  ;;  %v1574_v51 = vsel %vm4684_vm4, %v4548_v53, %v1570_v11  ;;  %v1585_v21 = vadd.f32 %v4581_v24, %v1584_v33  ;;  %v2003_v35 = vpop.f32.mrf.mxu0  ;;  %v752_v37 = vpop.f32.mrf.mxu2  ;;  %v2132_v13 = vld [vmem:[#allocation2 + $0xb0] sm:$0xff] }
 0x1e3   : > { %v4692_v12 = vpop.f32.mrf.mxu3  ;;  %vm1587_vm5 = vweird.f32 %v4581_v24  ;;  %v1613_v55 = vsub.f32 1.0, %v1612_v43  ;;  %v2571_v31 = vmul.f32 -1.442695, %v5216_v30  ;;  %v1600_v23 = vadd.f32 %v4601_v28, %v1599_v3 }
 0x1e4   : > { %v4699_v58 = vpop.eup %2959  ;;  %v1858_v2 = vpack.c.bf16 %v1828_v19, %v1826_v10  ;;  %vm1602_vm6 = vweird.f32 %v4601_v28  ;;  %v1627_v53 = vmul.f32 %v4678_v0, %v4624_v56  ;;  %v2573_v50 = vmul.f32 -1.442695, %v5217_v42  ;;  %vm4715_vm7 = vmor %vm1586_vm14, %vm1587_vm5 }
 0x1e5   : > { %v4704_v15 = vpop.eup %2961  ;;  %v1781_v29 = vmul.f32 %v1564_v57, %v5166_v46  ;;  %v1607_v59 = vand.u32 2147483648, %v4524_v6  ;;  %v1593_v61 = vor.u32 1.1754944e-38, %v1592_v62  ;;  %2967 = vrcp.f32 %v4689_v44 }
 0x1e6   : > { %v2964_v22 = vpop.eup %2963  ;;  %vm1601_vm8 = vweird.f32 %v4524_v6  ;;  %v1605_v14 = vand.u32 2147483647, %v4524_v6  ;;  %v1579_v11 = vsel %vm4656_vm1, %v4612_v49, %v1574_v51  ;;  %v1589_v1 = vsel %vm4715_vm7, %v4581_v24, %v1585_v21 }
 0x1e7   : > { %v2966_v46 = vpop.eup %2965  ;;  %v1829_v26 = vmul.f32 %v1781_v29, %v4629_v17  ;;  %vm4731_vm9 = vmor %vm1601_vm8, %vm1602_vm6  ;;  %v1614_v47 = vmul.f32 %v4643_v4, %v1613_v55  ;;  %v1642_v6 = vmul.f32 %v4699_v58, %v4637_v39  ;;  %2969 = vpow2.f32 %v2571_v31 }
 0x1e8   : > { %v1604_v49 = vsel %vm4731_vm9, %v4601_v28, %v1600_v23  ;;  %v1657_v24 = vmul.f32 %v4704_v15, %v4639_v8  ;;  %v1628_v17 = vsub.f32 1.0, %v1627_v53  ;;  %2971 = vpow2.f32 %v2573_v50  ;;  %v2072_v19 = vpop.f32.mrf.mxu1 }
 0x1e9   : > { %v1827_v27 = vmul.f32 %v1779_v52, %v4561_v40  ;;  %v1608_v33 = vor.u32 1.1754944e-38, %v1607_v59  ;;  %v4744_v54 = vadd.f32 1.0, %v2964_v22  ;;  %v4746_v43 = vadd.f32 1.0, %v2966_v46 }
 0x1ea   : > { %vm1606_vm10 = vcmp.eq.f32.partialorder %v1605_v14, 8.507059e+37  ;;  %vm1617_vm11 = vweird.f32 %v4643_v4  ;;  %v2073_v60 = vadd.f32 %v2072_v19, %v2003_v35  ;;  %v1615_v62 = vadd.f32 %v4643_v4, %v1614_v47  ;;  %v2005_v57 = vpop.f32.mrf.mxu0 }
 0x1eb   : > { %2042 = vmatmul.bf16.gmra.mxu0 %v1858_v2  ;;  %v1859_v3 = vpack.c.bf16 %v1829_v26, %v1827_v27  ;;  %v1609_v28 = vsel %vm1606_vm10, %v1608_v33, %v1604_v49  ;;  %v4750_v10 = vpop.eup %2967  ;;  %vm1591_vm12 = vcmp.eq.f32.partialorder %v1590_v7, 8.507059e+37  ;;  %v821_v40 = vpop.f32.mrf.mxu3  ;;  %v1622_v52 = vand.u32 2147483648, %v4577_v38  ;;  %v2133_v26 = vld [vmem:[#allocation2] sm:$0xff] }
 0x1ec   : > { %v1658_v51 = vsub.f32 1.0, %v1657_v24  ;;  %v1594_v21 = vsel %vm1591_vm12, %v1593_v61, %v1589_v1  ;;  %v4753_v55 = vadd.f32 %v2132_v13, %v2073_v60  ;;  %vm1616_vm13 = vweird.f32 %v4577_v38 }
 0x1ed   : > { %v1620_v31 = vand.u32 2147483647, %v4577_v38  ;;  %v2970_v2 = vpop.eup %2969  ;;  %v1782_v35 = vmul.f32 %v1579_v11, %v5171_v5  ;;  %v1643_v23 = vsub.f32 1.0, %v1642_v6  ;;  %2973 = vrcp.f32 %v4744_v54  ;;  %vm4762_vm14 = vmor %vm1616_vm13, %vm1617_vm11  ;;  %v4771_v38 = vpop.f32.mrf.mxu2 }
 0x1ee   : > { %v1784_v7 = vmul.f32 %v1609_v28, %v5177_v18  ;;  %v2972_v50 = vpop.eup %2971  ;;  %v1629_v29 = vmul.f32 %v4678_v0, %v1628_v17  ;;  %2975 = vrcp.f32 %v4746_v43  ;;  %v1619_v5 = vsel %vm4762_vm14, %v4643_v4, %v1615_v62 }
 0x1ef   : > { %2111 = vmatmul.bf16.gmra.mxu1 %v1859_v3  ;;  %v1672_v18 = vmul.f32 %v4750_v10, %v4689_v44  ;;  %v1783_v59 = vmul.f32 %v1594_v21, %v5176_v9  ;;  %v1623_v41 = vor.u32 1.1754944e-38, %v1622_v52  ;;  %v1659_v61 = vmul.f32 %v4704_v15, %v1658_v51 }
 0x1f0   : > { %v1832_v22 = vmul.f32 %v1784_v7, %v752_v37  ;;  %vm1631_vm15 = vweird.f32 %v4624_v56  ;;  %v1635_v14 = vand.u32 2147483647, %v4624_v56  ;;  %v1637_v46 = vand.u32 2147483648, %v4624_v56  ;;  %v2074_v1 = vpop.f32.mrf.mxu1 }
 0x1f1   : > { %vm1621_vm0 = vcmp.eq.f32.partialorder %v1620_v31, 8.507059e+37  ;;  %vm1632_vm1 = vweird.f32 %v4678_v0  ;;  %v4781_v4 = vadd.f32 1.0, %v2972_v50  ;;  %v1830_v11 = vmul.f32 %v1782_v35, %v4652_v16 }
 0x1f2   : > { %v1624_v9 = vsel %vm1621_vm0, %v1623_v41, %v1619_v5  ;;  %v1630_v37 = vadd.f32 %v4678_v0, %v1629_v29  ;;  %v1644_v32 = vmul.f32 %v4699_v58, %v1643_v23  ;;  %v2075_v47 = vadd.f32 %v2074_v1, %v2005_v57  ;;  %vm4802_vm3 = vmor %vm1631_vm15, %vm1632_vm1 }
 0x1f3   : > { %v1673_v6 = vsub.f32 1.0, %v1672_v18  ;;  %v4786_v49 = vpop.eup %2973  ;;  %v4788_v24 = vadd.f32 1.0, %v2970_v2  ;;  %v1860_v17 = vpack.c.bf16 %v1832_v22, %v1830_v11  ;;  %v1660_v27 = vadd.f32 %v4704_v15, %v1659_v61  ;;  %v4808_v62 = vpop.f32.mrf.mxu3  ;;  %v2134_v22 = vld [vmem:[#allocation2 + $0x10] sm:$0xff] }
 0x1f4   : > { %vm1662_vm2 = vweird.f32 %v4704_v15  ;;  %v4792_v33 = vpop.eup %2975  ;;  %v1638_v16 = vor.u32 1.1754944e-38, %v1637_v46  ;;  %v4794_v19 = vadd.f32 %v2133_v26, %v2075_v47  ;;  %v1785_v13 = vmul.f32 %v1624_v9, %v5186_v25 }
 0x1f5   : > { %v1667_v60 = vand.u32 2147483648, %v4639_v8  ;;  %vm1647_vm4 = vweird.f32 %v4699_v58  ;;  %2977 = vrcp.f32 %v4781_v4  ;;  %vm1661_vm5 = vweird.f32 %v4639_v8  ;;  %v757_v35 = vpop.f32.mrf.mxu2 }
 0x1f6   : > { %v1665_v25 = vand.u32 2147483647, %v4639_v8  ;;  %v1634_v57 = vsel %vm4802_vm3, %v4678_v0, %v1630_v37  ;;  %v1645_v56 = vadd.f32 %v4699_v58, %v1644_v32  ;;  %v1833_v52 = vmul.f32 %v1785_v13, %v821_v40  ;;  %vm4818_vm6 = vmor %vm1661_vm5, %vm1662_vm2 }
 0x1f7   : > { %v1674_v21 = vmul.f32 %v4750_v10, %v1673_v6  ;;  %v1687_v31 = vmul.f32 %v4786_v49, %v4744_v54  ;;  %2979 = vrcp.f32 %v4788_v24  ;;  %v1664_v8 = vsel %vm4818_vm6, %v4704_v15, %v1660_v27 }
 0x1f8   : > { %v2008_v3 = vpop.f32.mrf.mxu0  ;;  %v1717_v0 = vmul.f32 %v4792_v33, %v4746_v43  ;;  %vm1636_vm7 = vcmp.eq.f32.partialorder %v1635_v14, 8.507059e+37  ;;  %v1652_v40 = vand.u32 2147483648, %v4637_v39  ;;  %v1831_v2 = vmul.f32 %v1783_v59, %v4692_v12 }
 0x1f9   : > { %v1668_v23 = vor.u32 1.1754944e-38, %v1667_v60  ;;  %v1639_v7 = vsel %vm1636_vm7, %v1638_v16, %v1634_v57  ;;  %vm1646_vm8 = vweird.f32 %v4637_v39  ;;  %v1650_v53 = vand.u32 2147483647, %v4637_v39 }
 0x1fa   : > { %vm1666_vm9 = vcmp.eq.f32.partialorder %v1665_v25, 8.507059e+37  ;;  %vm4837_vm10 = vmor %vm1646_vm8, %vm1647_vm4  ;;  %v1861_v50 = vpack.c.bf16 %v1833_v52, %v1831_v2  ;;  %v1675_v5 = vadd.f32 %v4750_v10, %v1674_v21  ;;  %vm1677_vm11 = vweird.f32 %v4750_v10 }
 0x1fb   : > { %2047 = vmatmul.bf16.gmra.mxu0 %v1860_v17  ;;  %v1669_v29 = vsel %vm1666_vm9, %v1668_v23, %v1664_v8  ;;  %v4843_v12 = vpop.eup %2977  ;;  %v1649_v18 = vsel %vm4837_vm10, %v4699_v58, %v1645_v56  ;;  %v1688_v39 = vsub.f32 1.0, %v1687_v31  ;;  %v1682_v41 = vand.u32 2147483648, %v4689_v44  ;;  %v826_v27 = vpop.f32.mrf.mxu3  ;;  %v2135_v56 = vld [vmem:[#allocation2 + $0x48] sm:$0xff] }
 0x1fc   : > { %v2077_v59 = vpop.f32.mrf.mxu1  ;;  %v1718_v61 = vsub.f32 1.0, %v1717_v0  ;;  %v1653_v14 = vor.u32 1.1754944e-38, %v1652_v40  ;;  %vm1676_vm12 = vweird.f32 %v4689_v44  ;;  %v1680_v1 = vand.u32 2147483647, %v4689_v44 }
 0x1fd   : > { %v2078_v46 = vadd.f32 %v2077_v59, %v2008_v3  ;;  %v4851_v26 = vpop.eup %2979  ;;  %v1786_v9 = vmul.f32 %v1639_v7, %v5192_v36  ;;  %vm1651_vm13 = vcmp.eq.f32.partialorder %v1650_v53, 8.507059e+37  ;;  %v1788_v58 = vmul.f32 %v1669_v29, %v5196_v34  ;;  %vm1678_vm14 = vmor %vm1676_vm12, %vm1677_vm11 }
 0x1fe   : > { %v1654_v37 = vsel %vm1651_vm13, %v1653_v14, %v1649_v18  ;;  %v1679_v47 = vsel %vm1678_vm14, %v4750_v10, %v1675_v5  ;;  %v1732_v6 = vmul.f32 %v4843_v12, %v4781_v4  ;;  %v1689_v44 = vmul.f32 %v4786_v49, %v1688_v39  ;;  %v4869_v10 = vpop.f32.mrf.mxu2 }
 0x1ff   : > { %v4857_v32 = vadd.f32 %v2134_v22, %v2078_v46  ;;  %2116 = vmatmul.bf16.gmra.mxu1 %v1861_v50  ;;  %v1836_v17 = vmul.f32 %v1788_v58, %v757_v35  ;;  %v1683_v36 = vor.u32 1.1754944e-38, %v1682_v41  ;;  %v1719_v16 = vmul.f32 %v4792_v33, %v1718_v61 }
 0x200   : > { %v2010_v11 = vpop.f32.mrf.mxu0  ;;  %v1702_v34 = vmul.f32 %v4851_v26, %v4788_v24  ;;  %vm1681_vm15 = vcmp.eq.f32.partialorder %v1680_v1, 8.507059e+37  ;;  %v1834_v13 = vmul.f32 %v1786_v9, %v4771_v38  ;;  %v1787_v60 = vmul.f32 %v1654_v37, %v5193_v63 }
 0x201   : > { %v1684_v3 = vsel %vm1681_vm15, %v1683_v36, %v1679_v47  ;;  %vm1692_vm0 = vweird.f32 %v4786_v49  ;;  %v1733_v28 = vsub.f32 1.0, %v1732_v6  ;;  %v1690_v25 = vadd.f32 %v4786_v49, %v1689_v44 }
 0x202   : > { %v1862_v52 = vpack.c.bf16 %v1836_v17, %v1834_v13  ;;  %v1720_v51 = vadd.f32 %v4792_v33, %v1719_v16  ;;  %vm1722_vm1 = vweird.f32 %v4792_v33  ;;  %v1703_v21 = vsub.f32 1.0, %v1702_v34  ;;  %v2137_v34 = vld [vmem:[#allocation2 + $0x28] sm:$0xff] }
 0x203   : > { %v1789_v38 = vmul.f32 %v1684_v3, %v5204_v48  ;;  %v1727_v63 = vand.u32 2147483648, %v4746_v43  ;;  %v1695_v0 = vand.u32 2147483647, %v4744_v54  ;;  %v1697_v40 = vand.u32 2147483648, %v4744_v54  ;;  %v829_v5 = vpop.f32.mrf.mxu3 }
 0x204   : > { %v2079_v57 = vpop.f32.mrf.mxu1  ;;  %vm1721_vm2 = vweird.f32 %v4746_v43  ;;  %v1725_v2 = vand.u32 2147483647, %v4746_v43  ;;  %vm1691_vm3 = vweird.f32 %v4744_v54  ;;  %v1734_v7 = vmul.f32 %v4843_v12, %v1733_v28 }
 0x205   : > { %v2080_v31 = vadd.f32 %v2079_v57, %v2010_v11  ;;  %v1837_v23 = vmul.f32 %v1789_v38, %v826_v27  ;;  %vm1723_vm4 = vmor %vm1721_vm2, %vm1722_vm1  ;;  %v1704_v54 = vmul.f32 %v4851_v26, %v1703_v21  ;;  %v1835_v15 = vmul.f32 %v1787_v60, %v4808_v62 }
 0x206   : > { %vm4886_vm5 = vmor %vm1691_vm3, %vm1692_vm0  ;;  %v1724_v53 = vsel %vm1723_vm4, %v4792_v33, %v1720_v51  ;;  %v1728_v50 = vor.u32 1.1754944e-38, %v1727_v63  ;;  %vm1696_vm6 = vcmp.eq.f32.partialorder %v1695_v0, 8.507059e+37  ;;  %v1698_v29 = vor.u32 1.1754944e-38, %v1697_v40  ;;  %v762_v46 = vpop.f32.mrf.mxu2  ;;  %v2140_v40 = vld [vmem:[#allocation2 + $0x88] sm:$0xff] }
 0x207   : > { %v4881_v35 = vadd.f32 %v2135_v56, %v2080_v31  ;;  %v1694_v43 = vsel %vm4886_vm5, %v4786_v49, %v1690_v25  ;;  %vm1726_vm7 = vcmp.eq.f32.partialorder %v1725_v2, 8.507059e+37  ;;  %v1863_v18 = vpack.c.bf16 %v1837_v23, %v1835_v15  ;;  %v2136_v49 = vld [vmem:[#allocation2 + $0x60] sm:$0xff] }
 0x208   : > { %v2013_v8 = vpop.f32.mrf.mxu0  ;;  %v1729_v39 = vsel %vm1726_vm7, %v1728_v50, %v1724_v53  ;;  %v1735_v59 = vadd.f32 %v4843_v12, %v1734_v7  ;;  %vm1737_vm8 = vweird.f32 %v4843_v12  ;;  %v1699_v33 = vsel %vm1696_vm6, %v1698_v29, %v1694_v43  ;;  %v2141_v53 = vld [vmem:[#allocation2 + $0x90] sm:$0xff]  ;;  %v2142_v29 = vld [vmem:[#allocation2 + $0x18] sm:$0xff] }
 0x209   : > { %vm1707_vm9 = vweird.f32 %v4851_v26  ;;  %v1742_v41 = vand.u32 2147483648, %v4781_v4  ;;  %v1705_v62 = vadd.f32 %v4851_v26, %v1704_v54  ;;  %vm1736_vm10 = vweird.f32 %v4781_v4 }
 0x20a   : > { %v1740_v11 = vand.u32 2147483647, %v4781_v4  ;;  %v1712_v1 = vand.u32 2147483648, %v4788_v24  ;;  %v1792_v9 = vmul.f32 %v1729_v39, %v5209_v20  ;;  %vm1738_vm11 = vmor %vm1736_vm10, %vm1737_vm8  ;;  %vm1706_vm12 = vweird.f32 %v4788_v24 }
 0x20b   : > { %2052 = vmatmul.bf16.gmra.mxu0 %v1862_v52  ;;  %v1710_v58 = vand.u32 2147483647, %v4788_v24  ;;  %v1739_v47 = vsel %vm1738_vm11, %v4843_v12, %v1735_v59  ;;  %v1790_v6 = vmul.f32 %v1699_v33, %v5208_v45  ;;  %vm1708_vm13 = vmor %vm1706_vm12, %vm1707_vm9  ;;  %v1743_v44 = vor.u32 1.1754944e-38, %v1742_v41  ;;  %v831_v12 = vpop.f32.mrf.mxu3  ;;  %v2138_v52 = vld [vmem:[#allocation2 + $0x40] sm:$0xff]  ;;  %v2143_v33 = vld [vmem:[#allocation2 + $0x98] sm:$0xff] }
 0x20c   : > { %v2082_v22 = vpop.f32.mrf.mxu1  ;;  %v1840_v4 = vmul.f32 %v1792_v9, %v762_v46  ;;  %v1709_v17 = vsel %vm1708_vm13, %v4851_v26, %v1705_v62  ;;  %vm1741_vm14 = vcmp.eq.f32.partialorder %v1740_v11, 8.507059e+37  ;;  %v1713_v20 = vor.u32 1.1754944e-38, %v1712_v1  ;;  %v2145_v9 = vld [vmem:[#allocation2 + $0x50] sm:$0xff] }
 0x20d   : > { %v2083_v61 = vadd.f32 %v2082_v22, %v2013_v8  ;;  %v1838_v27 = vmul.f32 %v1790_v6, %v4869_v10  ;;  %v1744_v36 = vsel %vm1741_vm14, %v1743_v44, %v1739_v47  ;;  %vm1711_vm15 = vcmp.eq.f32.partialorder %v1710_v58, 8.507059e+37  ;;  %v2139_v8 = vld [vmem:[#allocation2 + $0x78] sm:$0xff]  ;;  %v2146_v44 = vld [vmem:[#allocation2 + $0x70] sm:$0xff] }
 0x20e   : > { %v1714_v24 = vsel %vm1711_vm15, %v1713_v20, %v1709_v17  ;;  %v1793_v45 = vmul.f32 %v1744_v36, %v5217_v42 }
 0x20f   : > { %v4907_v37 = vadd.f32 %v2136_v49, %v2083_v61  ;;  %2121 = vmatmul.bf16.gmra.mxu1 %v1863_v18  ;;  %v1864_v13 = vpack.c.bf16 %v1840_v4, %v1838_v27  ;;  %v1791_v28 = vmul.f32 %v1714_v24, %v5216_v30  ;;  %v2144_v61 = vld [vmem:[#allocation2 + $0x38] sm:$0xff]  ;;  %v2147_v24 = vld [vmem:[#allocation2 + $0xa0] sm:$0xff] }
 0x210   : > { %v2015_v14 = vpop.f32.mrf.mxu0  ;;  %v1841_v26 = vmul.f32 %v1793_v45, %v831_v12 }
 0x211   : > { %v1839_v57 = vmul.f32 %v1791_v28, %v829_v5 }
 0x213   : > { %v1865_v56 = vpack.c.bf16 %v1841_v26, %v1839_v57  ;;  %v2149_v57 = vld [vmem:[#allocation2 + $0x68] sm:$0xff] }
 0x214   : > { %v2084_v16 = vpop.f32.mrf.mxu1 }
 0x215   : > { %v2085_v3 = vadd.f32 %v2084_v16, %v2015_v14 }
 0x217   : > { %v4917_v25 = vadd.f32 %v2137_v34, %v2085_v3  ;;  %v2148_v3 = vld [vmem:[#allocation2 + $0xa8] sm:$0xff] }
 0x218   : > { %v2018_v60 = vpop.f32.mrf.mxu0 }
 0x21b   : > { %2057 = vmatmul.bf16.gmra.mxu0 %v1864_v13 }
 0x21c   : > { %v2087_v10 = vpop.f32.mrf.mxu1 }
 0x21d   : > { %v2088_v51 = vadd.f32 %v2087_v10, %v2018_v60 }
 0x21f   : > { %v4919_v31 = vadd.f32 %v2138_v52, %v2088_v51  ;;  %2126 = vmatmul.bf16.gmra.mxu1 %v1865_v56 }
 0x220   : > { %v2020_v21 = vpop.f32.mrf.mxu0 }
 0x224   : > { %v2089_v38 = vpop.f32.mrf.mxu1 }
 0x225   : > { %v2090_v63 = vadd.f32 %v2089_v38, %v2020_v21  ;;  %v2150_v21 = vld [vmem:[#allocation2 + $0x30] sm:$0xff] }
 0x227   : > { %v4921_v0 = vadd.f32 %v2139_v8, %v2090_v63 }
 0x228   : > { %v2023_v42 = vpop.f32.mrf.mxu0 }
 0x22c   : > { %v2092_v30 = vpop.f32.mrf.mxu1 }
 0x22d   : > { %v2093_v2 = vadd.f32 %v2092_v30, %v2023_v42  ;;  %v2151_v30 = vld [vmem:[#allocation2 + $0x58] sm:$0xff] }
 0x22f   : > { %v4923_v7 = vadd.f32 %v2140_v40, %v2093_v2 }
 0x230   : > { %v2025_v23 = vpop.f32.mrf.mxu0 }
 0x234   : > { %v2094_v48 = vpop.f32.mrf.mxu1 }
 0x235   : > { %v2095_v43 = vadd.f32 %v2094_v48, %v2025_v23 }
 0x237   : > { %v4925_v15 = vadd.f32 %v2141_v53, %v2095_v43  ;;  %v2152_v53 = vld [vmem:[#allocation2 + $0x80] sm:$0xff] }
 0x238   : > { %v2028_v54 = vpop.f32.mrf.mxu0 }
 0x23c   : > { %v2097_v50 = vpop.f32.mrf.mxu1 }
 0x23d   : > { %v2098_v5 = vadd.f32 %v2097_v50, %v2028_v54 }
 0x23f   : > { %v4927_v39 = vadd.f32 %v2142_v29, %v2098_v5  ;;  %v2153_v5 = vld [vmem:[#allocation2 + $0xb8] sm:$0xff] }
 0x240   : > { %v2030_v18 = vpop.f32.mrf.mxu0 }
 0x244   : > { %v2099_v59 = vpop.f32.mrf.mxu1 }
 0x245   : > { %v2100_v22 = vadd.f32 %v2099_v59, %v2030_v18 }
 0x247   : > { %v4929_v41 = vadd.f32 %v2143_v33, %v2100_v22 }
 0x248   : > { %v2033_v49 = vpop.f32.mrf.mxu0 }
 0x24c   : > { %v2102_v62 = vpop.f32.mrf.mxu1 }
 0x24d   : > { %v2103_v14 = vadd.f32 %v2102_v62, %v2033_v49  ;;  %v2154_v49 = vld [vmem:[#allocation2 + $0x20] sm:$0xff] }
 0x24f   : > { %v4931_v11 = vadd.f32 %v2144_v61, %v2103_v14 }
 0x250   : > { %v2035_v46 = vpop.f32.mrf.mxu0 }
 0x254   : > { %v2104_v1 = vpop.f32.mrf.mxu1 }
 0x255   : > { %v2105_v58 = vadd.f32 %v2104_v1, %v2035_v46  ;;  %v2155_v1 = vld [vmem:[#allocation2 + $0x8] sm:$0xff] }
 0x257   : > { %v4933_v6 = vadd.f32 %v2145_v9, %v2105_v58 }
 0x258   : > { %v2038_v47 = vpop.f32.mrf.mxu0 }
 0x25c   : > { %v2107_v4 = vpop.f32.mrf.mxu1 }
 0x25d   : > { %v2108_v17 = vadd.f32 %v2107_v4, %v2038_v47 }
 0x25f   : > { %v4935_v27 = vadd.f32 %v2146_v44, %v2108_v17 }
 0x260   : > { %v2040_v20 = vpop.f32.mrf.mxu0 }
 0x264   : > { %v2109_v36 = vpop.f32.mrf.mxu1 }
 0x265   : > { %v2110_v16 = vadd.f32 %v2109_v36, %v2040_v20 }
 0x267   : > { %v4937_v13 = vadd.f32 %v2147_v24, %v2110_v16 }
 0x268   : > { %v2043_v34 = vpop.f32.mrf.mxu0 }
 0x26c   : > { %v2112_v12 = vpop.f32.mrf.mxu1 }
 0x26d   : > { %v2113_v45 = vadd.f32 %v2112_v12, %v2043_v34 }
 0x26f   : > { %v4939_v28 = vadd.f32 %v2148_v3, %v2113_v45 }
 0x270   : > { %v2045_v60 = vpop.f32.mrf.mxu0 }
 0x274   : > { %v2114_v26 = vpop.f32.mrf.mxu1 }
 0x275   : > { %v2115_v56 = vadd.f32 %v2114_v26, %v2045_v60 }
 0x277   : > { %v4941_v52 = vadd.f32 %v2149_v57, %v2115_v56 }
 0x278   : > { %v2048_v10 = vpop.f32.mrf.mxu0 }
 0x27c   : > { %v2117_v51 = vpop.f32.mrf.mxu1 }
 0x27d   : > { %v2118_v38 = vadd.f32 %v2117_v51, %v2048_v10 }
 0x27f   : > { %v4943_v63 = vadd.f32 %v2150_v21, %v2118_v38 }
 0x280   : > { %v2050_v8 = vpop.f32.mrf.mxu0 }
 0x284   : > { %v2119_v42 = vpop.f32.mrf.mxu1 }
 0x285   : > { %v2120_v40 = vadd.f32 %v2119_v42, %v2050_v8 }
 0x287   : > { %v4945_v23 = vadd.f32 %v2151_v30, %v2120_v40 }
 0x288   : > { %v2053_v2 = vpop.f32.mrf.mxu0 }
 0x28c   : > { %v2122_v48 = vpop.f32.mrf.mxu1 }
 0x28d   : > { %v2123_v43 = vadd.f32 %v2122_v48, %v2053_v2 }
 0x28f   : > { %v4947_v50 = vadd.f32 %v2152_v53, %v2123_v43 }
 0x290   : > { %v2055_v54 = vpop.f32.mrf.mxu0 }
 0x294   : > { %v2124_v29 = vpop.f32.mrf.mxu1 }
 0x295   : > { %v2125_v18 = vadd.f32 %v2124_v29, %v2055_v54 }
 0x297   : > { %v2177_v59 = vadd.f32 %v2153_v5, %v2125_v18 }
 0x298   : > { %v2058_v33 = vpop.f32.mrf.mxu0 }
 0x29c   : > { %v2127_v22 = vpop.f32.mrf.mxu1 }
 0x29d   : > { %v2128_v62 = vadd.f32 %v2127_v22, %v2058_v33 }
 0x29f   : > { %v2178_v61 = vadd.f32 %v2154_v49, %v2128_v62 }
 0x2a0   : > { %v2060_v14 = vpop.f32.mrf.mxu0 }
 0x2a3   : > { %2183 = sbr.rel (%p2638_p1) target bundleno = 704 (0x2c0), region = 44 }
 0x2a4   : > { %v2129_v46 = vpop.f32.mrf.mxu1 }
 0x2a5   : > { %v2130_v9 = vadd.f32 %v2129_v46, %v2060_v14 }
 0x2a7   : > { %v2179_v58 = vadd.f32 %v2155_v1, %v2130_v9 }
 0x2a8   : > { %2184 = vst [vmem:[#allocation2 + $0xb0] sm:$0xff] %v4753_v55 }
 0x2a9   : > { %2185 = vst [vmem:[#allocation2] sm:$0xff] %v4794_v19 }
 0x2aa   : > { %2186 = vst [vmem:[#allocation2 + $0x10] sm:$0xff] %v4857_v32 }
 0x2ab   : > { %2187 = vst [vmem:[#allocation2 + $0x48] sm:$0xff] %v4881_v35 }
 0x2ac   : > { %2188 = vst [vmem:[#allocation2 + $0x60] sm:$0xff] %v4907_v37 }
 0x2ad   : > { %2189 = vst [vmem:[#allocation2 + $0x28] sm:$0xff] %v4917_v25 }
 0x2ae   : > { %2190 = vst [vmem:[#allocation2 + $0x40] sm:$0xff] %v4919_v31 }
 0x2af   : > { %2191 = vst [vmem:[#allocation2 + $0x78] sm:$0xff] %v4921_v0 }
 0x2b0   : > { %2192 = vst [vmem:[#allocation2 + $0x88] sm:$0xff] %v4923_v7 }
 0x2b1   : > { %2193 = vst [vmem:[#allocation2 + $0x90] sm:$0xff] %v4925_v15 }
 0x2b2   : > { %2194 = vst [vmem:[#allocation2 + $0x18] sm:$0xff] %v4927_v39 }
 0x2b3   : > { %2195 = vst [vmem:[#allocation2 + $0x98] sm:$0xff] %v4929_v41 }
 0x2b4   : > { %2196 = vst [vmem:[#allocation2 + $0x38] sm:$0xff] %v4931_v11 }
 0x2b5   : > { %2197 = vst [vmem:[#allocation2 + $0x50] sm:$0xff] %v4933_v6 }
 0x2b6   : > { %2198 = vst [vmem:[#allocation2 + $0x70] sm:$0xff] %v4935_v27 }
 0x2b7   : > { %2199 = vst [vmem:[#allocation2 + $0xa0] sm:$0xff] %v4937_v13 }
 0x2b8   : > { %2200 = vst [vmem:[#allocation2 + $0xa8] sm:$0xff] %v4939_v28 }
 0x2b9   : > { %2201 = vst [vmem:[#allocation2 + $0x68] sm:$0xff] %v4941_v52 }
 0x2ba   : > { %2202 = vst [vmem:[#allocation2 + $0x30] sm:$0xff] %v4943_v63 }
 0x2bb   : > { %2203 = vst [vmem:[#allocation2 + $0x58] sm:$0xff] %v4945_v23 }
 0x2bc   : > { %2204 = vst [vmem:[#allocation2 + $0x80] sm:$0xff] %v4947_v50 }
 0x2bd   : > { %2205 = vst [vmem:[#allocation2 + $0xb8] sm:$0xff] %v2177_v59 }
 0x2be   : > { %2206 = vst [vmem:[#allocation2 + $0x20] sm:$0xff] %v2178_v61 }
 0x2bf   : > { %2207 = vst [vmem:[#allocation2 + $0x8] sm:$0xff] %v2179_v58 }
 0x2c0 PF: > { %p2639_p2 = scmp.ne.s32.totalorder %s3085_s15, 1 }
 0x2c2   : > { %2211 = sbr.rel (%p2639_p2) target bundleno = 735 (0x2df), region = 48 }
 0x2c7   : > { %2212 = vst [vmem:[#allocation6] sm:$0xff] %v4753_v55 }
 0x2c8   : > { %2213 = vst [vmem:[#allocation6 + $0x8] sm:$0xff] %v4794_v19 }
 0x2c9   : > { %2214 = vst [vmem:[#allocation6 + $0x10] sm:$0xff] %v4857_v32 }
 0x2ca   : > { %2215 = vst [vmem:[#allocation6 + $0x18] sm:$0xff] %v4881_v35 }
 0x2cb   : > { %2216 = vst [vmem:[#allocation6 + $0x20] sm:$0xff] %v4907_v37 }
 0x2cc   : > { %2217 = vst [vmem:[#allocation6 + $0x28] sm:$0xff] %v4917_v25 }
 0x2cd   : > { %2218 = vst [vmem:[#allocation6 + $0x30] sm:$0xff] %v4919_v31 }
 0x2ce   : > { %2219 = vst [vmem:[#allocation6 + $0x38] sm:$0xff] %v4921_v0 }
 0x2cf   : > { %2220 = vst [vmem:[#allocation6 + $0x40] sm:$0xff] %v4923_v7 }
 0x2d0   : > { %2221 = vst [vmem:[#allocation6 + $0x48] sm:$0xff] %v4925_v15 }
 0x2d1   : > { %2222 = vst [vmem:[#allocation6 + $0x50] sm:$0xff] %v4927_v39 }
 0x2d2   : > { %2223 = vst [vmem:[#allocation6 + $0x58] sm:$0xff] %v4929_v41 }
 0x2d3   : > { %2224 = vst [vmem:[#allocation6 + $0x60] sm:$0xff] %v4931_v11 }
 0x2d4   : > { %2225 = vst [vmem:[#allocation6 + $0x68] sm:$0xff] %v4933_v6 }
 0x2d5   : > { %2226 = vst [vmem:[#allocation6 + $0x70] sm:$0xff] %v4935_v27 }
 0x2d6   : > { %2227 = vst [vmem:[#allocation6 + $0x78] sm:$0xff] %v4937_v13 }
 0x2d7   : > { %2228 = vst [vmem:[#allocation6 + $0x80] sm:$0xff] %v4939_v28 }
 0x2d8   : > { %2229 = vst [vmem:[#allocation6 + $0x88] sm:$0xff] %v4941_v52 }
 0x2d9   : > { %2230 = vst [vmem:[#allocation6 + $0x90] sm:$0xff] %v4943_v63 }
 0x2da   : > { %2231 = vst [vmem:[#allocation6 + $0x98] sm:$0xff] %v4945_v23 }
 0x2db   : > { %2232 = vst [vmem:[#allocation6 + $0xa0] sm:$0xff] %v4947_v50 }
 0x2dc   : > { %2233 = vst [vmem:[#allocation6 + $0xa8] sm:$0xff] %v2177_v59 }
 0x2dd   : > { %2234 = vst [vmem:[#allocation6 + $0xb0] sm:$0xff] %v2178_v61 }
 0x2de   : > { %2235 = vst [vmem:[#allocation6 + $0xb8] sm:$0xff] %v2179_v58 }
 0x2df PF: > { %p2732_p3 = scmp.eq.s32.totalorder %s2338_s18, 1  ;;  %s2246_s7 = sshll.u32 %s5019_s3, 4  ;;  %s2247_s7 = int_to_ptr.hbm [resolvable:$true] %s2246_s7 }
 0x2e0   : > { %s3099_s8 = smov [#allocation6]   ;;  %s3100_s10 = smov 128  }
 0x2e1   : > { %s2244_s9 = sshll.u32 %s3099_s8, 4  ;;  %s3101_s11 = smov 8   ;;  %s2245_s9 = int_to_ptr.vmem [resolvable:$true] %s2244_s9 }
 0x2e2   : > { %2724 = dma.vmem_to_hbm [thread:$0]  (%p2732_p3), %s2245_s9, 3072, %s2247_s7, [#allocation5], %s3100_s10, %s3100_s10, %s3101_s11  }
 0x2e3   : > { %3068 = dma.done.wait (%p2732_p3), [#allocation5], 3072  }
 0x2e4   : > { %3070 = vsyncadd (%p2732_p3), [#allocation5], 4294964224 }
 0x2e5 PF: > { %s17_s17 = sadd.s32 1, %s3093_s17   ;;  %s5232_s12 = smov %s3077_s13 }
 0x2e6   : > { %p14_p4 = scmp.ge.s32.totalorder %s17_s17, 4   ;;  %s5233_s13 = smov %s3081_s14 }
 0x2e7   : > { %s5234_s14 = smov %s3173_s24  ;;  %s5235_s15 = smov %s3089_s16 }
 0x2e8   : > { %s5236_s16 = smov %s5238_s19  ;;  %16 = sbr.rel (!%p14_p4) target bundleno = 5 (0x5), region = 88 }
 0x2ed   :  { %2263 = vsyncpa [#allocation4], 1 }
 0x2ee   :  { %2265 = vsyncpa [#allocation4 + $0x1], 1 }
 0x2ef   :  { %2266 = vsyncpa [#allocation5], 1 }
 0x2f0   :  { %2268 = vsyncpa [#allocation5 + $0x1], 1 }

</bundles_post_ra>
